<compile_context>
chip_gen: v7x
topology: tpu7x:2x2x1
jax: 0.10.0
libtpu: 0.0.40
codegen_flags: <defaults>
</compile_context>

<pallas_src>
import numpy as np

import jax
import jax.numpy as jnp
from jax import lax
from jax.experimental import pallas as pl
from jax.experimental.pallas import tpu as pltpu

# ----------------------------------------------------------------------------
# Static LeNet geometry (fixed by fc1 = Linear(16*5*5, 120) -> 32x32x3 input).
# ----------------------------------------------------------------------------
HW_IN = 32                  # input spatial size
IC1, OC1, KS = 3, 6, 5      # conv1: 3 -> 6, 5x5
IC2, OC2 = 6, 16            # conv2: 6 -> 16, 5x5
P1 = 14                     # pooled conv1 spatial size (28 / 2)
P2 = 5                      # pooled conv2 spatial size (10 / 2)
XCOLS = HW_IN * IC1         # 96  : (w, ic) interleaved on lanes
C1COLS = P1 * OC1           # 84  : (pw, oc) interleaved on lanes
C2COLS = P2 * OC2           # 80  : (pw, oc) interleaved on lanes
NPAD = 128                  # lane-dense padding for activations / FC stack
NFUSE = 2 * NPAD            # fused even|odd conv output lanes
NCLASS = 102


# ----------------------------------------------------------------------------
# Raw (PyTorch-layout) parameters + one-time packing into kernel layout.
# ----------------------------------------------------------------------------
def init_lenet_params(key):
    ks = jax.random.split(key, 10)
    s = 0.05
    return {
        "conv1_w": jax.random.normal(ks[0], (6, 3, 5, 5), jnp.float32) * s,
        "conv1_b": jax.random.normal(ks[1], (6,), jnp.float32) * s,
        "conv2_w": jax.random.normal(ks[2], (16, 6, 5, 5), jnp.float32) * s,
        "conv2_b": jax.random.normal(ks[3], (16,), jnp.float32) * s,
        "fc1_w": jax.random.normal(ks[4], (120, 400), jnp.float32) * s,  # [out, in]
        "fc1_b": jax.random.normal(ks[5], (120,), jnp.float32) * s,
        "fc2_w": jax.random.normal(ks[6], (84, 120), jnp.float32) * s,
        "fc2_b": jax.random.normal(ks[7], (84,), jnp.float32) * s,
        "fc3_w": jax.random.normal(ks[8], (102, 84), jnp.float32) * s,
        "fc3_b": jax.random.normal(ks[9], (102,), jnp.float32) * s,
    }


def pack_params(raw):
    """One-time packing of PyTorch-layout weights into the structured matrices
    the fused kernel consumes (all layout work moved out of the forward)."""
    g = lambda k: np.asarray(raw[k], dtype=np.float32)
    w1, b1 = g("conv1_w"), g("conv1_b")        # (6,3,5,5), (6,)
    w2, b2 = g("conv2_w"), g("conv2_b")        # (16,6,5,5), (16,)
    f1w, f1b = g("fc1_w"), g("fc1_b")          # (120,400), (120,)
    f2w, f2b = g("fc2_w"), g("fc2_b")          # (84,120), (84,)
    f3w, f3b = g("fc3_w"), g("fc3_b")          # (102,84), (102,)

    # conv1: fused even|odd banded weight. W1[kh][w*IC1+ic, pw*OC1+oc] maps a
    # 14-row slice of the input straight to the conv output at ow = 2*pw (even
    # half, lanes [0,128)) and ow = 2*pw+1 (odd half, lanes [128,256)).
    W1 = np.zeros((KS, XCOLS, NFUSE), np.float32)
    for kh in range(KS):
        for kw in range(KS):
            blk = w1[:, :, kh, kw].T                        # (ic, oc) = (3, 6)
            for pw in range(P1):
                we = 2 * pw + kw
                wo = we + 1
                W1[kh, we * IC1:(we + 1) * IC1, pw * OC1:(pw + 1) * OC1] = blk
                W1[kh, wo * IC1:(wo + 1) * IC1,
                   NPAD + pw * OC1:NPAD + (pw + 1) * OC1] = blk
    B1 = np.zeros((1, NPAD), np.float32)
    B1[0, :C1COLS] = np.tile(b1, P1)

    # conv2: same construction on the pooled (14, 84->128) conv1 map.
    W2 = np.zeros((KS, NPAD, NFUSE), np.float32)
    for kh in range(KS):
        for kw in range(KS):
            blk = w2[:, :, kh, kw].T                        # (ic, oc) = (6, 16)
            for pw2 in range(P2):
                we = 2 * pw2 + kw
                wo = we + 1
                W2[kh, we * IC2:(we + 1) * IC2, pw2 * OC2:(pw2 + 1) * OC2] = blk
                W2[kh, wo * IC2:(wo + 1) * IC2,
                   NPAD + pw2 * OC2:NPAD + (pw2 + 1) * OC2] = blk
    B2 = np.zeros((1, NPAD), np.float32)
    B2[0, :C2COLS] = np.tile(b2, P2)

    # fc1: contract the (5, 80->128) pooled conv2 map row by row; fold the
    # PyTorch NCHW flatten order (c*25 + h*5 + w) and the 128-lane padding.
    Wf1 = np.zeros((P2, NPAD, NPAD), np.float32)
    for r in range(P2):
        for pw2 in range(P2):
            src = f1w[:, np.arange(OC2) * 25 + r * 5 + pw2]  # (120, 16)
            Wf1[r, pw2 * OC2:(pw2 + 1) * OC2, :120] = src.T
    Bf1 = np.zeros((1, NPAD), np.float32)
    Bf1[0, :120] = f1b

    Wf2 = np.zeros((NPAD, NPAD), np.float32)
    Wf2[:120, :84] = f2w.T
    Bf2 = np.zeros((1, NPAD), np.float32)
    Bf2[0, :84] = f2b

    Wf3 = np.zeros((NPAD, NPAD), np.float32)
    Wf3[:84, :NCLASS] = f3w.T
    Bf3 = np.zeros((1, NPAD), np.float32)
    Bf3[0, :NCLASS] = f3b

    packed = dict(w1=W1, b1=B1, w2=W2, b2=B2,
                  wf1=Wf1, bf1=Bf1, wf2=Wf2, bf2=Bf2, wf3=Wf3, bf3=Bf3)
    return {k: jnp.asarray(v) for k, v in packed.items()}


# ----------------------------------------------------------------------------
# Fused forward kernel: Bt images per grid step, everything resident in VMEM.
# ----------------------------------------------------------------------------
def _lenet_fused_kernel(x_ref,
                        w1_ref, b1_ref, w2_ref, b2_ref,
                        wf1_ref, bf1_ref, wf2_ref, bf2_ref, wf3_ref, bf3_ref,
                        o_ref,
                        h1_ref, h2b_ref):
    f32 = jnp.float32
    bt = x_ref.shape[0]

    # ---- per-image conv stack (small accumulators -> low vreg pressure) -----
    def _per_image(i, carry):
        # conv1 (5x5, 3->6) + ReLU + 2x2/2 max-pool, fused.
        # acc_e / acc_o hold conv rows 2*ph / 2*ph+1; lanes [0,128) are even
        # output columns, [128,256) odd output columns (fused weight).
        acc_e = jnp.zeros((P1, NFUSE), f32)
        acc_o = jnp.zeros((P1, NFUSE), f32)
        for kh in range(KS):
            m = kh // 2
            if kh % 2 == 0:
                xe = x_ref[i, 0, pl.ds(m, P1), :]        # rows 2*ph + kh
                xo = x_ref[i, 1, pl.ds(m, P1), :]        # rows 2*ph + 1 + kh
            else:
                xe = x_ref[i, 1, pl.ds(m, P1), :]
                xo = x_ref[i, 0, pl.ds(m + 1, P1), :]
            w = w1_ref[kh]                               # (96, 256)
            acc_e = acc_e + jnp.dot(xe, w, preferred_element_type=f32)
            acc_o = acc_o + jnp.dot(xo, w, preferred_element_type=f32)
        m1 = jnp.maximum(jnp.maximum(acc_e[:, :NPAD], acc_e[:, NPAD:]),
                         jnp.maximum(acc_o[:, :NPAD], acc_o[:, NPAD:]))
        h1_ref[...] = jnp.maximum(m1 + b1_ref[...], 0.0)  # (14, 128) in VMEM

        # conv2 (5x5, 6->16) + ReLU + 2x2/2 max-pool.
        acc2_e = jnp.zeros((P2, NFUSE), f32)
        acc2_o = jnp.zeros((P2, NFUSE), f32)
        for kh in range(KS):
            pe = h1_ref[pl.ds(kh, P2, stride=2), :]       # rows 2*ph2 + kh
            po = h1_ref[pl.ds(kh + 1, P2, stride=2), :]   # rows 2*ph2 + 1 + kh
            w = w2_ref[kh]                                # (128, 256)
            acc2_e = acc2_e + jnp.dot(pe, w, preferred_element_type=f32)
            acc2_o = acc2_o + jnp.dot(po, w, preferred_element_type=f32)
        m2 = jnp.maximum(jnp.maximum(acc2_e[:, :NPAD], acc2_e[:, NPAD:]),
                         jnp.maximum(acc2_o[:, :NPAD], acc2_o[:, NPAD:]))
        h2 = jnp.maximum(m2 + b2_ref[...], 0.0)           # (5, 128)

        # Stage into the batched (P2, Bt, 128) scratch so the FC stack runs
        # with M = Bt.
        h2b_ref[:, pl.ds(i, 1), :] = h2[:, None, :]
        return carry

    lax.fori_loop(0, bt, _per_image, 0)

    # ---- batched FC stack: (Bt, 128) @ (128, 128) MXU matmuls ---------------
    a = jnp.zeros((bt, NPAD), f32)
    for r in range(P2):                                    # fc1 (400 -> 120)
        a = a + jnp.dot(h2b_ref[r], wf1_ref[r], preferred_element_type=f32)
    a = jnp.maximum(a + bf1_ref[...], 0.0)
    a = jnp.maximum(jnp.dot(a, wf2_ref[...], preferred_element_type=f32)
                    + bf2_ref[...], 0.0)                   # fc2 (120 -> 84)
    a = jnp.dot(a, wf3_ref[...], preferred_element_type=f32) + bf3_ref[...]
    o_ref[...] = a                                         # (Bt, 128) lane-dense


def lenet_forward(packed, x_nchw, *, batch_tile=128):
    """x_nchw: [B, 3, 32, 32] float32 -> logits [B, 102] (PyTorch semantics)."""
    B = x_nchw.shape[0]
    if B <= batch_tile:
        Bt = B                                  # single block == full array
    else:
        Bt = max(8, (batch_tile // 8) * 8)      # keep (Bt, 128) out block aligned
    nblk = -(-B // Bt)
    Bp = nblk * Bt

    # Wrapper-side layout plumbing only: NCHW -> NHWC -> (B, 32, 96), then
    # parity-split the 32 rows so every conv1 kh-slice is contiguous.
    x = jnp.transpose(x_nchw, (0, 2, 3, 1)).reshape(B, HW_IN, XCOLS)
    x = x.reshape(B, HW_IN // 2, 2, XCOLS).transpose(0, 2, 1, 3)  # (B,2,16,96)
    if Bp != B:
        x = jnp.pad(x, ((0, Bp - B), (0, 0), (0, 0), (0, 0)))

    def _const_spec(a):
        return pl.BlockSpec(a.shape, lambda b: (0,) * a.ndim)

    weight_keys = ("w1", "b1", "w2", "b2",
                   "wf1", "bf1", "wf2", "bf2", "wf3", "bf3")
    in_specs = [pl.BlockSpec((Bt, 2, HW_IN // 2, XCOLS), lambda b: (b, 0, 0, 0))]
    in_specs += [_const_spec(packed[k]) for k in weight_keys]

    out = pl.pallas_call(
        _lenet_fused_kernel,
        out_shape=jax.ShapeDtypeStruct((Bp, NPAD), jnp.float32),
        grid=(nblk,),
        in_specs=in_specs,
        out_specs=pl.BlockSpec((Bt, NPAD), lambda b: (b, 0)),
        scratch_shapes=[pltpu.VMEM((P1, NPAD), jnp.float32),        # pooled conv1 (per image)
                        pltpu.VMEM((P2, Bt, NPAD), jnp.float32)],   # pooled conv2 (whole tile)
        compiler_params=pltpu.CompilerParams(
            dimension_semantics=("parallel",)),
    )(x, *[packed[k] for k in weight_keys])
    return out[:B, :NCLASS]


# ----------------------------------------------------------------------------
# Plain-JAX reference of the PyTorch module (numerical sanity check).
# ----------------------------------------------------------------------------
def lenet_reference(raw, x_nchw):
    def conv(x, w, b):
        y = jax.lax.conv_general_dilated(
            x, w, window_strides=(1, 1), padding="VALID",
            dimension_numbers=("NCHW", "OIHW", "NCHW"))
        return y + b[None, :, None, None]

    def pool(x):
        return jax.lax.reduce_window(x, -jnp.inf, jax.lax.max,
                                     (1, 1, 2, 2), (1, 1, 2, 2), "VALID")

    x = pool(jax.nn.relu(conv(x_nchw, raw["conv1_w"], raw["conv1_b"])))
    x = pool(jax.nn.relu(conv(x, raw["conv2_w"], raw["conv2_b"])))
    x = x.reshape(x.shape[0], -1)                    # (C, H, W) order == view()
    x = jax.nn.relu(x @ raw["fc1_w"].T + raw["fc1_b"])
    x = jax.nn.relu(x @ raw["fc2_w"].T + raw["fc2_b"])
    return x @ raw["fc3_w"].T + raw["fc3_b"]


if __name__ == "__main__":
    key = jax.random.PRNGKey(0)
    k_params, k_x = jax.random.split(key)
    raw = init_lenet_params(k_params)
    packed = pack_params(raw)                         # one-time layout packing

    # Small demo batch: single grid block (Bt == B).
    x = jax.random.normal(k_x, (8, 3, 32, 32), jnp.float32)
    fwd = jax.jit(lenet_forward)
    out = jax.block_until_ready(fwd(packed, x))
    assert out.shape == (8, NCLASS), out.shape
    assert out.dtype == jnp.float32
    assert bool(jnp.all(jnp.isfinite(out)))
    ref = lenet_reference(raw, x)
    max_err = float(jnp.max(jnp.abs(out - ref)))
    assert max_err < 2e-2, f"max abs error vs reference: {max_err}"

    # Exercise the batch-tiled path: multiple grid blocks + batch padding.
    x2 = jax.random.normal(jax.random.PRNGKey(1), (20, 3, 32, 32), jnp.float32)
    fwd_tiled = jax.jit(lambda p, xx: lenet_forward(p, xx, batch_tile=8))
    out2 = jax.block_until_ready(fwd_tiled(packed, x2))
    assert out2.shape == (20, NCLASS), out2.shape
    ref2 = lenet_reference(raw, x2)
    max_err2 = float(jnp.max(jnp.abs(out2 - ref2)))
    assert max_err2 < 2e-2, f"max abs error (tiled) vs reference: {max_err2}"

    print("KERNEL_OK")
</pallas_src>

<mosaic_0001>
module attributes {stable_mosaic.version = 11 : i64} {
  func.func @_lenet_fused_kernel(%arg0: i32, %arg1: memref<8x2x16x96xf32, #tpu.memory_space<vmem>>, %arg2: memref<5x96x256xf32, #tpu.memory_space<vmem>>, %arg3: memref<1x128xf32, #tpu.memory_space<vmem>>, %arg4: memref<5x128x256xf32, #tpu.memory_space<vmem>>, %arg5: memref<1x128xf32, #tpu.memory_space<vmem>>, %arg6: memref<5x128x128xf32, #tpu.memory_space<vmem>>, %arg7: memref<1x128xf32, #tpu.memory_space<vmem>>, %arg8: memref<128x128xf32, #tpu.memory_space<vmem>>, %arg9: memref<1x128xf32, #tpu.memory_space<vmem>>, %arg10: memref<128x128xf32, #tpu.memory_space<vmem>>, %arg11: memref<1x128xf32, #tpu.memory_space<vmem>>, %arg12: memref<8x128xf32, #tpu.memory_space<vmem>>, %arg13: memref<14x128xf32, #tpu.memory_space<vmem>>, %arg14: memref<5x8x128xf32, #tpu.memory_space<vmem>>) attributes {dimension_semantics = [#tpu.dimension_semantics<parallel>], iteration_bounds = array<i64: 1>, scalar_prefetch = 0 : i64, scratch_operands = 2 : i64, tpu.core_type = #tpu.core_type<tc>, window_params = [{transform_indices = @transform_0, window_bounds = array<i64: 8, 2, 16, 96>}, {pipeline_mode = #tpu.pipeline_mode<synchronous>, transform_indices = @transform_1, window_bounds = array<i64: 5, 96, 256>}, {pipeline_mode = #tpu.pipeline_mode<synchronous>, transform_indices = @transform_2, window_bounds = array<i64: 1, 128>}, {pipeline_mode = #tpu.pipeline_mode<synchronous>, transform_indices = @transform_3, window_bounds = array<i64: 5, 128, 256>}, {pipeline_mode = #tpu.pipeline_mode<synchronous>, transform_indices = @transform_4, window_bounds = array<i64: 1, 128>}, {pipeline_mode = #tpu.pipeline_mode<synchronous>, transform_indices = @transform_5, window_bounds = array<i64: 5, 128, 128>}, {pipeline_mode = #tpu.pipeline_mode<synchronous>, transform_indices = @transform_6, window_bounds = array<i64: 1, 128>}, {pipeline_mode = #tpu.pipeline_mode<synchronous>, transform_indices = @transform_7, window_bounds = array<i64: 128, 128>}, {pipeline_mode = #tpu.pipeline_mode<synchronous>, transform_indices = @transform_8, window_bounds = array<i64: 1, 128>}, {pipeline_mode = #tpu.pipeline_mode<synchronous>, transform_indices = @transform_9, window_bounds = array<i64: 128, 128>}, {pipeline_mode = #tpu.pipeline_mode<synchronous>, transform_indices = @transform_10, window_bounds = array<i64: 1, 128>}, {transform_indices = @transform_11, window_bounds = array<i64: 8, 128>}]} {
    %c0_i32 = arith.constant 0 : i32
    %c8_i32 = arith.constant 8 : i32
    %0 = arith.addi %c0_i32, %c8_i32 : i32
    %c1_i32 = arith.constant 1 : i32
    scf.for %arg15 = %c0_i32 to %0 step %c1_i32  : i32 {
      %cst_47 = arith.constant 0.000000e+00 : f32
      %50 = vector.broadcast %cst_47 : f32 to vector<14x256xf32>
      %cst_48 = arith.constant 0.000000e+00 : f32
      %51 = vector.broadcast %cst_48 : f32 to vector<14x256xf32>
      %52 = arith.index_cast %arg15 : i32 to index
      %c0_49 = arith.constant 0 : index
      %c0_50 = arith.constant 0 : index
      %c0_51 = arith.constant 0 : index
      %53 = vector.load %arg1[%52, %c0_49, %c0_50, %c0_51] : memref<8x2x16x96xf32, #tpu.memory_space<vmem>>, vector<1x1x14x96xf32>
      %54 = vector.shape_cast %53 : vector<1x1x14x96xf32> to vector<14x96xf32>
      %55 = arith.index_cast %arg15 : i32 to index
      %c1_52 = arith.constant 1 : index
      %c0_53 = arith.constant 0 : index
      %c0_54 = arith.constant 0 : index
      %56 = vector.load %arg1[%55, %c1_52, %c0_53, %c0_54] : memref<8x2x16x96xf32, #tpu.memory_space<vmem>>, vector<1x1x14x96xf32>
      %57 = vector.shape_cast %56 : vector<1x1x14x96xf32> to vector<14x96xf32>
      %c0_55 = arith.constant 0 : index
      %c0_56 = arith.constant 0 : index
      %c0_57 = arith.constant 0 : index
      %58 = vector.load %arg2[%c0_55, %c0_56, %c0_57] : memref<5x96x256xf32, #tpu.memory_space<vmem>>, vector<1x96x256xf32>
      %59 = vector.shape_cast %58 : vector<1x96x256xf32> to vector<96x256xf32>
      %cst_58 = arith.constant dense<0.000000e+00> : vector<14x256xf32>
      %60 = tpu.matmul %54, %59, %cst_58 {dimension_numbers = #tpu.dot_dimension_numbers<[1], [0], [0], [1], [0, 0, 1, 1], [], []>} : vector<14x96xf32>, vector<96x256xf32>, vector<14x256xf32> -> vector<14x256xf32>
      %61 = arith.addf %50, %60 : vector<14x256xf32>
      %cst_59 = arith.constant dense<0.000000e+00> : vector<14x256xf32>
      %62 = tpu.matmul %57, %59, %cst_59 {dimension_numbers = #tpu.dot_dimension_numbers<[1], [0], [0], [1], [0, 0, 1, 1], [], []>} : vector<14x96xf32>, vector<96x256xf32>, vector<14x256xf32> -> vector<14x256xf32>
      %63 = arith.addf %51, %62 : vector<14x256xf32>
      %64 = arith.index_cast %arg15 : i32 to index
      %c1_60 = arith.constant 1 : index
      %c0_61 = arith.constant 0 : index
      %c0_62 = arith.constant 0 : index
      %65 = vector.load %arg1[%64, %c1_60, %c0_61, %c0_62] : memref<8x2x16x96xf32, #tpu.memory_space<vmem>>, vector<1x1x14x96xf32>
      %66 = vector.shape_cast %65 : vector<1x1x14x96xf32> to vector<14x96xf32>
      %67 = arith.index_cast %arg15 : i32 to index
      %c0_63 = arith.constant 0 : index
      %c1_64 = arith.constant 1 : index
      %c0_65 = arith.constant 0 : index
      %68 = vector.load %arg1[%67, %c0_63, %c1_64, %c0_65] : memref<8x2x16x96xf32, #tpu.memory_space<vmem>>, vector<1x1x14x96xf32>
      %69 = vector.shape_cast %68 : vector<1x1x14x96xf32> to vector<14x96xf32>
      %c1_66 = arith.constant 1 : index
      %c0_67 = arith.constant 0 : index
      %c0_68 = arith.constant 0 : index
      %70 = vector.load %arg2[%c1_66, %c0_67, %c0_68] : memref<5x96x256xf32, #tpu.memory_space<vmem>>, vector<1x96x256xf32>
      %71 = vector.shape_cast %70 : vector<1x96x256xf32> to vector<96x256xf32>
      %cst_69 = arith.constant dense<0.000000e+00> : vector<14x256xf32>
      %72 = tpu.matmul %66, %71, %cst_69 {dimension_numbers = #tpu.dot_dimension_numbers<[1], [0], [0], [1], [0, 0, 1, 1], [], []>} : vector<14x96xf32>, vector<96x256xf32>, vector<14x256xf32> -> vector<14x256xf32>
      %73 = arith.addf %61, %72 : vector<14x256xf32>
      %cst_70 = arith.constant dense<0.000000e+00> : vector<14x256xf32>
      %74 = tpu.matmul %69, %71, %cst_70 {dimension_numbers = #tpu.dot_dimension_numbers<[1], [0], [0], [1], [0, 0, 1, 1], [], []>} : vector<14x96xf32>, vector<96x256xf32>, vector<14x256xf32> -> vector<14x256xf32>
      %75 = arith.addf %63, %74 : vector<14x256xf32>
      %76 = arith.index_cast %arg15 : i32 to index
      %c0_71 = arith.constant 0 : index
      %c1_72 = arith.constant 1 : index
      %c0_73 = arith.constant 0 : index
      %77 = vector.load %arg1[%76, %c0_71, %c1_72, %c0_73] : memref<8x2x16x96xf32, #tpu.memory_space<vmem>>, vector<1x1x14x96xf32>
      %78 = vector.shape_cast %77 : vector<1x1x14x96xf32> to vector<14x96xf32>
      %79 = arith.index_cast %arg15 : i32 to index
      %c1_74 = arith.constant 1 : index
      %c1_75 = arith.constant 1 : index
      %c0_76 = arith.constant 0 : index
      %80 = vector.load %arg1[%79, %c1_74, %c1_75, %c0_76] : memref<8x2x16x96xf32, #tpu.memory_space<vmem>>, vector<1x1x14x96xf32>
      %81 = vector.shape_cast %80 : vector<1x1x14x96xf32> to vector<14x96xf32>
      %c2_77 = arith.constant 2 : index
      %c0_78 = arith.constant 0 : index
      %c0_79 = arith.constant 0 : index
      %82 = vector.load %arg2[%c2_77, %c0_78, %c0_79] : memref<5x96x256xf32, #tpu.memory_space<vmem>>, vector<1x96x256xf32>
      %83 = vector.shape_cast %82 : vector<1x96x256xf32> to vector<96x256xf32>
      %cst_80 = arith.constant dense<0.000000e+00> : vector<14x256xf32>
      %84 = tpu.matmul %78, %83, %cst_80 {dimension_numbers = #tpu.dot_dimension_numbers<[1], [0], [0], [1], [0, 0, 1, 1], [], []>} : vector<14x96xf32>, vector<96x256xf32>, vector<14x256xf32> -> vector<14x256xf32>
      %85 = arith.addf %73, %84 : vector<14x256xf32>
      %cst_81 = arith.constant dense<0.000000e+00> : vector<14x256xf32>
      %86 = tpu.matmul %81, %83, %cst_81 {dimension_numbers = #tpu.dot_dimension_numbers<[1], [0], [0], [1], [0, 0, 1, 1], [], []>} : vector<14x96xf32>, vector<96x256xf32>, vector<14x256xf32> -> vector<14x256xf32>
      %87 = arith.addf %75, %86 : vector<14x256xf32>
      %88 = arith.index_cast %arg15 : i32 to index
      %c1_82 = arith.constant 1 : index
      %c1_83 = arith.constant 1 : index
      %c0_84 = arith.constant 0 : index
      %89 = vector.load %arg1[%88, %c1_82, %c1_83, %c0_84] : memref<8x2x16x96xf32, #tpu.memory_space<vmem>>, vector<1x1x14x96xf32>
      %90 = vector.shape_cast %89 : vector<1x1x14x96xf32> to vector<14x96xf32>
      %91 = arith.index_cast %arg15 : i32 to index
      %c0_85 = arith.constant 0 : index
      %c2_86 = arith.constant 2 : index
      %c0_87 = arith.constant 0 : index
      %92 = vector.load %arg1[%91, %c0_85, %c2_86, %c0_87] : memref<8x2x16x96xf32, #tpu.memory_space<vmem>>, vector<1x1x14x96xf32>
      %93 = vector.shape_cast %92 : vector<1x1x14x96xf32> to vector<14x96xf32>
      %c3_88 = arith.constant 3 : index
      %c0_89 = arith.constant 0 : index
      %c0_90 = arith.constant 0 : index
      %94 = vector.load %arg2[%c3_88, %c0_89, %c0_90] : memref<5x96x256xf32, #tpu.memory_space<vmem>>, vector<1x96x256xf32>
      %95 = vector.shape_cast %94 : vector<1x96x256xf32> to vector<96x256xf32>
      %cst_91 = arith.constant dense<0.000000e+00> : vector<14x256xf32>
      %96 = tpu.matmul %90, %95, %cst_91 {dimension_numbers = #tpu.dot_dimension_numbers<[1], [0], [0], [1], [0, 0, 1, 1], [], []>} : vector<14x96xf32>, vector<96x256xf32>, vector<14x256xf32> -> vector<14x256xf32>
      %97 = arith.addf %85, %96 : vector<14x256xf32>
      %cst_92 = arith.constant dense<0.000000e+00> : vector<14x256xf32>
      %98 = tpu.matmul %93, %95, %cst_92 {dimension_numbers = #tpu.dot_dimension_numbers<[1], [0], [0], [1], [0, 0, 1, 1], [], []>} : vector<14x96xf32>, vector<96x256xf32>, vector<14x256xf32> -> vector<14x256xf32>
      %99 = arith.addf %87, %98 : vector<14x256xf32>
      %100 = arith.index_cast %arg15 : i32 to index
      %c0_93 = arith.constant 0 : index
      %c2_94 = arith.constant 2 : index
      %c0_95 = arith.constant 0 : index
      %101 = vector.load %arg1[%100, %c0_93, %c2_94, %c0_95] : memref<8x2x16x96xf32, #tpu.memory_space<vmem>>, vector<1x1x14x96xf32>
      %102 = vector.shape_cast %101 : vector<1x1x14x96xf32> to vector<14x96xf32>
      %103 = arith.index_cast %arg15 : i32 to index
      %c1_96 = arith.constant 1 : index
      %c2_97 = arith.constant 2 : index
      %c0_98 = arith.constant 0 : index
      %104 = vector.load %arg1[%103, %c1_96, %c2_97, %c0_98] : memref<8x2x16x96xf32, #tpu.memory_space<vmem>>, vector<1x1x14x96xf32>
      %105 = vector.shape_cast %104 : vector<1x1x14x96xf32> to vector<14x96xf32>
      %c4_99 = arith.constant 4 : index
      %c0_100 = arith.constant 0 : index
      %c0_101 = arith.constant 0 : index
      %106 = vector.load %arg2[%c4_99, %c0_100, %c0_101] : memref<5x96x256xf32, #tpu.memory_space<vmem>>, vector<1x96x256xf32>
      %107 = vector.shape_cast %106 : vector<1x96x256xf32> to vector<96x256xf32>
      %cst_102 = arith.constant dense<0.000000e+00> : vector<14x256xf32>
      %108 = tpu.matmul %102, %107, %cst_102 {dimension_numbers = #tpu.dot_dimension_numbers<[1], [0], [0], [1], [0, 0, 1, 1], [], []>} : vector<14x96xf32>, vector<96x256xf32>, vector<14x256xf32> -> vector<14x256xf32>
      %109 = arith.addf %97, %108 : vector<14x256xf32>
      %cst_103 = arith.constant dense<0.000000e+00> : vector<14x256xf32>
      %110 = tpu.matmul %105, %107, %cst_103 {dimension_numbers = #tpu.dot_dimension_numbers<[1], [0], [0], [1], [0, 0, 1, 1], [], []>} : vector<14x96xf32>, vector<96x256xf32>, vector<14x256xf32> -> vector<14x256xf32>
      %111 = arith.addf %99, %110 : vector<14x256xf32>
      %112 = vector.extract_strided_slice %109 {offsets = [0, 0], sizes = [14, 128], strides = [1, 1]} : vector<14x256xf32> to vector<14x128xf32>
      %113 = vector.extract_strided_slice %109 {offsets = [0, 128], sizes = [14, 128], strides = [1, 1]} : vector<14x256xf32> to vector<14x128xf32>
      %114 = arith.maximumf %112, %113 : vector<14x128xf32>
      %115 = vector.extract_strided_slice %111 {offsets = [0, 0], sizes = [14, 128], strides = [1, 1]} : vector<14x256xf32> to vector<14x128xf32>
      %116 = vector.extract_strided_slice %111 {offsets = [0, 128], sizes = [14, 128], strides = [1, 1]} : vector<14x256xf32> to vector<14x128xf32>
      %117 = arith.maximumf %115, %116 : vector<14x128xf32>
      %118 = arith.maximumf %114, %117 : vector<14x128xf32>
      %c0_104 = arith.constant 0 : index
      %c0_105 = arith.constant 0 : index
      %119 = vector.load %arg3[%c0_104, %c0_105] : memref<1x128xf32, #tpu.memory_space<vmem>>, vector<1x128xf32>
      %120 = vector.broadcast %119 : vector<1x128xf32> to vector<14x128xf32>
      %121 = arith.addf %118, %120 : vector<14x128xf32>
      %cst_106 = arith.constant 0.000000e+00 : f32
      %122 = vector.broadcast %cst_106 : f32 to vector<14x128xf32>
      %123 = arith.maximumf %121, %122 : vector<14x128xf32>
      %c0_107 = arith.constant 0 : index
      %c0_108 = arith.constant 0 : index
      %124 = vector.load %arg13[%c0_107, %c0_108] : memref<14x128xf32, #tpu.memory_space<vmem>>, vector<14x128xf32>
      tpu.vector_store %arg13[%c0_107, %c0_108], %123 {strides = array<i32>} : memref<14x128xf32, #tpu.memory_space<vmem>>, vector<14x128xf32>,
      %cst_109 = arith.constant 0.000000e+00 : f32
      %125 = vector.broadcast %cst_109 : f32 to vector<5x256xf32>
      %cst_110 = arith.constant 0.000000e+00 : f32
      %126 = vector.broadcast %cst_110 : f32 to vector<5x256xf32>
      %c0_111 = arith.constant 0 : index
      %c0_112 = arith.constant 0 : index
      %127 = tpu.strided_load %arg13[%c0_111, %c0_112] {strides = array<i32: 2, 1>} : memref<14x128xf32, #tpu.memory_space<vmem>>, vector<5x128xf32>
      %c1_113 = arith.constant 1 : index
      %c0_114 = arith.constant 0 : index
      %128 = tpu.strided_load %arg13[%c1_113, %c0_114] {strides = array<i32: 2, 1>} : memref<14x128xf32, #tpu.memory_space<vmem>>, vector<5x128xf32>
      %c0_115 = arith.constant 0 : index
      %c0_116 = arith.constant 0 : index
      %c0_117 = arith.constant 0 : index
      %129 = vector.load %arg4[%c0_115, %c0_116, %c0_117] : memref<5x128x256xf32, #tpu.memory_space<vmem>>, vector<1x128x256xf32>
      %130 = vector.shape_cast %129 : vector<1x128x256xf32> to vector<128x256xf32>
      %cst_118 = arith.constant dense<0.000000e+00> : vector<5x256xf32>
      %131 = tpu.matmul %127, %130, %cst_118 {dimension_numbers = #tpu.dot_dimension_numbers<[1], [0], [0], [1], [0, 0, 1, 1], [], []>} : vector<5x128xf32>, vector<128x256xf32>, vector<5x256xf32> -> vector<5x256xf32>
      %132 = arith.addf %125, %131 : vector<5x256xf32>
      %cst_119 = arith.constant dense<0.000000e+00> : vector<5x256xf32>
      %133 = tpu.matmul %128, %130, %cst_119 {dimension_numbers = #tpu.dot_dimension_numbers<[1], [0], [0], [1], [0, 0, 1, 1], [], []>} : vector<5x128xf32>, vector<128x256xf32>, vector<5x256xf32> -> vector<5x256xf32>
      %134 = arith.addf %126, %133 : vector<5x256xf32>
      %c1_120 = arith.constant 1 : index
      %c0_121 = arith.constant 0 : index
      %135 = tpu.strided_load %arg13[%c1_120, %c0_121] {strides = array<i32: 2, 1>} : memref<14x128xf32, #tpu.memory_space<vmem>>, vector<5x128xf32>
      %c2_122 = arith.constant 2 : index
      %c0_123 = arith.constant 0 : index
      %136 = tpu.strided_load %arg13[%c2_122, %c0_123] {strides = array<i32: 2, 1>} : memref<14x128xf32, #tpu.memory_space<vmem>>, vector<5x128xf32>
      %c1_124 = arith.constant 1 : index
      %c0_125 = arith.constant 0 : index
      %c0_126 = arith.constant 0 : index
      %137 = vector.load %arg4[%c1_124, %c0_125, %c0_126] : memref<5x128x256xf32, #tpu.memory_space<vmem>>, vector<1x128x256xf32>
      %138 = vector.shape_cast %137 : vector<1x128x256xf32> to vector<128x256xf32>
      %cst_127 = arith.constant dense<0.000000e+00> : vector<5x256xf32>
      %139 = tpu.matmul %135, %138, %cst_127 {dimension_numbers = #tpu.dot_dimension_numbers<[1], [0], [0], [1], [0, 0, 1, 1], [], []>} : vector<5x128xf32>, vector<128x256xf32>, vector<5x256xf32> -> vector<5x256xf32>
      %140 = arith.addf %132, %139 : vector<5x256xf32>
      %cst_128 = arith.constant dense<0.000000e+00> : vector<5x256xf32>
      %141 = tpu.matmul %136, %138, %cst_128 {dimension_numbers = #tpu.dot_dimension_numbers<[1], [0], [0], [1], [0, 0, 1, 1], [], []>} : vector<5x128xf32>, vector<128x256xf32>, vector<5x256xf32> -> vector<5x256xf32>
      %142 = arith.addf %134, %141 : vector<5x256xf32>
      %c2_129 = arith.constant 2 : index
      %c0_130 = arith.constant 0 : index
      %143 = tpu.strided_load %arg13[%c2_129, %c0_130] {strides = array<i32: 2, 1>} : memref<14x128xf32, #tpu.memory_space<vmem>>, vector<5x128xf32>
      %c3_131 = arith.constant 3 : index
      %c0_132 = arith.constant 0 : index
      %144 = tpu.strided_load %arg13[%c3_131, %c0_132] {strides = array<i32: 2, 1>} : memref<14x128xf32, #tpu.memory_space<vmem>>, vector<5x128xf32>
      %c2_133 = arith.constant 2 : index
      %c0_134 = arith.constant 0 : index
      %c0_135 = arith.constant 0 : index
      %145 = vector.load %arg4[%c2_133, %c0_134, %c0_135] : memref<5x128x256xf32, #tpu.memory_space<vmem>>, vector<1x128x256xf32>
      %146 = vector.shape_cast %145 : vector<1x128x256xf32> to vector<128x256xf32>
      %cst_136 = arith.constant dense<0.000000e+00> : vector<5x256xf32>
      %147 = tpu.matmul %143, %146, %cst_136 {dimension_numbers = #tpu.dot_dimension_numbers<[1], [0], [0], [1], [0, 0, 1, 1], [], []>} : vector<5x128xf32>, vector<128x256xf32>, vector<5x256xf32> -> vector<5x256xf32>
      %148 = arith.addf %140, %147 : vector<5x256xf32>
      %cst_137 = arith.constant dense<0.000000e+00> : vector<5x256xf32>
      %149 = tpu.matmul %144, %146, %cst_137 {dimension_numbers = #tpu.dot_dimension_numbers<[1], [0], [0], [1], [0, 0, 1, 1], [], []>} : vector<5x128xf32>, vector<128x256xf32>, vector<5x256xf32> -> vector<5x256xf32>
      %150 = arith.addf %142, %149 : vector<5x256xf32>
      %c3_138 = arith.constant 3 : index
      %c0_139 = arith.constant 0 : index
      %151 = tpu.strided_load %arg13[%c3_138, %c0_139] {strides = array<i32: 2, 1>} : memref<14x128xf32, #tpu.memory_space<vmem>>, vector<5x128xf32>
      %c4_140 = arith.constant 4 : index
      %c0_141 = arith.constant 0 : index
      %152 = tpu.strided_load %arg13[%c4_140, %c0_141] {strides = array<i32: 2, 1>} : memref<14x128xf32, #tpu.memory_space<vmem>>, vector<5x128xf32>
      %c3_142 = arith.constant 3 : index
      %c0_143 = arith.constant 0 : index
      %c0_144 = arith.constant 0 : index
      %153 = vector.load %arg4[%c3_142, %c0_143, %c0_144] : memref<5x128x256xf32, #tpu.memory_space<vmem>>, vector<1x128x256xf32>
      %154 = vector.shape_cast %153 : vector<1x128x256xf32> to vector<128x256xf32>
      %cst_145 = arith.constant dense<0.000000e+00> : vector<5x256xf32>
      %155 = tpu.matmul %151, %154, %cst_145 {dimension_numbers = #tpu.dot_dimension_numbers<[1], [0], [0], [1], [0, 0, 1, 1], [], []>} : vector<5x128xf32>, vector<128x256xf32>, vector<5x256xf32> -> vector<5x256xf32>
      %156 = arith.addf %148, %155 : vector<5x256xf32>
      %cst_146 = arith.constant dense<0.000000e+00> : vector<5x256xf32>
      %157 = tpu.matmul %152, %154, %cst_146 {dimension_numbers = #tpu.dot_dimension_numbers<[1], [0], [0], [1], [0, 0, 1, 1], [], []>} : vector<5x128xf32>, vector<128x256xf32>, vector<5x256xf32> -> vector<5x256xf32>
      %158 = arith.addf %150, %157 : vector<5x256xf32>
      %c4_147 = arith.constant 4 : index
      %c0_148 = arith.constant 0 : index
      %159 = tpu.strided_load %arg13[%c4_147, %c0_148] {strides = array<i32: 2, 1>} : memref<14x128xf32, #tpu.memory_space<vmem>>, vector<5x128xf32>
      %c5 = arith.constant 5 : index
      %c0_149 = arith.constant 0 : index
      %160 = tpu.strided_load %arg13[%c5, %c0_149] {strides = array<i32: 2, 1>} : memref<14x128xf32, #tpu.memory_space<vmem>>, vector<5x128xf32>
      %c4_150 = arith.constant 4 : index
      %c0_151 = arith.constant 0 : index
      %c0_152 = arith.constant 0 : index
      %161 = vector.load %arg4[%c4_150, %c0_151, %c0_152] : memref<5x128x256xf32, #tpu.memory_space<vmem>>, vector<1x128x256xf32>
      %162 = vector.shape_cast %161 : vector<1x128x256xf32> to vector<128x256xf32>
      %cst_153 = arith.constant dense<0.000000e+00> : vector<5x256xf32>
      %163 = tpu.matmul %159, %162, %cst_153 {dimension_numbers = #tpu.dot_dimension_numbers<[1], [0], [0], [1], [0, 0, 1, 1], [], []>} : vector<5x128xf32>, vector<128x256xf32>, vector<5x256xf32> -> vector<5x256xf32>
      %164 = arith.addf %156, %163 : vector<5x256xf32>
      %cst_154 = arith.constant dense<0.000000e+00> : vector<5x256xf32>
      %165 = tpu.matmul %160, %162, %cst_154 {dimension_numbers = #tpu.dot_dimension_numbers<[1], [0], [0], [1], [0, 0, 1, 1], [], []>} : vector<5x128xf32>, vector<128x256xf32>, vector<5x256xf32> -> vector<5x256xf32>
      %166 = arith.addf %158, %165 : vector<5x256xf32>
      %167 = vector.extract_strided_slice %164 {offsets = [0, 0], sizes = [5, 128], strides = [1, 1]} : vector<5x256xf32> to vector<5x128xf32>
      %168 = vector.extract_strided_slice %164 {offsets = [0, 128], sizes = [5, 128], strides = [1, 1]} : vector<5x256xf32> to vector<5x128xf32>
      %169 = arith.maximumf %167, %168 : vector<5x128xf32>
      %170 = vector.extract_strided_slice %166 {offsets = [0, 0], sizes = [5, 128], strides = [1, 1]} : vector<5x256xf32> to vector<5x128xf32>
      %171 = vector.extract_strided_slice %166 {offsets = [0, 128], sizes = [5, 128], strides = [1, 1]} : vector<5x256xf32> to vector<5x128xf32>
      %172 = arith.maximumf %170, %171 : vector<5x128xf32>
      %173 = arith.maximumf %169, %172 : vector<5x128xf32>
      %c0_155 = arith.constant 0 : index
      %c0_156 = arith.constant 0 : index
      %174 = vector.load %arg5[%c0_155, %c0_156] : memref<1x128xf32, #tpu.memory_space<vmem>>, vector<1x128xf32>
      %175 = vector.broadcast %174 : vector<1x128xf32> to vector<5x128xf32>
      %176 = arith.addf %173, %175 : vector<5x128xf32>
      %cst_157 = arith.constant 0.000000e+00 : f32
      %177 = vector.broadcast %cst_157 : f32 to vector<5x128xf32>
      %178 = arith.maximumf %176, %177 : vector<5x128xf32>
      %179 = vector.shape_cast %178 : vector<5x128xf32> to vector<5x1x128xf32>
      %c0_158 = arith.constant 0 : index
      %180 = arith.index_cast %arg15 : i32 to index
      %c0_159 = arith.constant 0 : index
      %181 = vector.load %arg14[%c0_158, %180, %c0_159] : memref<5x8x128xf32, #tpu.memory_space<vmem>>, vector<5x1x128xf32>
      tpu.vector_store %arg14[%c0_158, %180, %c0_159], %179 {strides = array<i32>} : memref<5x8x128xf32, #tpu.memory_space<vmem>>, vector<5x1x128xf32>,
    }
    %c8_i32_0 = arith.constant 8 : i32
    %cst = arith.constant 0.000000e+00 : f32
    %1 = vector.broadcast %cst : f32 to vector<8x128xf32>
    %c0 = arith.constant 0 : index
    %c0_1 = arith.constant 0 : index
    %c0_2 = arith.constant 0 : index
    %2 = vector.load %arg14[%c0, %c0_1, %c0_2] : memref<5x8x128xf32, #tpu.memory_space<vmem>>, vector<1x8x128xf32>
    %3 = vector.shape_cast %2 : vector<1x8x128xf32> to vector<8x128xf32>
    %c0_3 = arith.constant 0 : index
    %c0_4 = arith.constant 0 : index
    %c0_5 = arith.constant 0 : index
    %4 = vector.load %arg6[%c0_3, %c0_4, %c0_5] : memref<5x128x128xf32, #tpu.memory_space<vmem>>, vector<1x128x128xf32>
    %5 = vector.shape_cast %4 : vector<1x128x128xf32> to vector<128x128xf32>
    %cst_6 = arith.constant dense<0.000000e+00> : vector<8x128xf32>
    %6 = tpu.matmul %3, %5, %cst_6 {dimension_numbers = #tpu.dot_dimension_numbers<[1], [0], [0], [1], [0, 0, 1, 1], [], []>} : vector<8x128xf32>, vector<128x128xf32>, vector<8x128xf32> -> vector<8x128xf32>
    %7 = arith.addf %1, %6 : vector<8x128xf32>
    %c1 = arith.constant 1 : index
    %c0_7 = arith.constant 0 : index
    %c0_8 = arith.constant 0 : index
    %8 = vector.load %arg14[%c1, %c0_7, %c0_8] : memref<5x8x128xf32, #tpu.memory_space<vmem>>, vector<1x8x128xf32>
    %9 = vector.shape_cast %8 : vector<1x8x128xf32> to vector<8x128xf32>
    %c1_9 = arith.constant 1 : index
    %c0_10 = arith.constant 0 : index
    %c0_11 = arith.constant 0 : index
    %10 = vector.load %arg6[%c1_9, %c0_10, %c0_11] : memref<5x128x128xf32, #tpu.memory_space<vmem>>, vector<1x128x128xf32>
    %11 = vector.shape_cast %10 : vector<1x128x128xf32> to vector<128x128xf32>
    %cst_12 = arith.constant dense<0.000000e+00> : vector<8x128xf32>
    %12 = tpu.matmul %9, %11, %cst_12 {dimension_numbers = #tpu.dot_dimension_numbers<[1], [0], [0], [1], [0, 0, 1, 1], [], []>} : vector<8x128xf32>, vector<128x128xf32>, vector<8x128xf32> -> vector<8x128xf32>
    %13 = arith.addf %7, %12 : vector<8x128xf32>
    %c2 = arith.constant 2 : index
    %c0_13 = arith.constant 0 : index
    %c0_14 = arith.constant 0 : index
    %14 = vector.load %arg14[%c2, %c0_13, %c0_14] : memref<5x8x128xf32, #tpu.memory_space<vmem>>, vector<1x8x128xf32>
    %15 = vector.shape_cast %14 : vector<1x8x128xf32> to vector<8x128xf32>
    %c2_15 = arith.constant 2 : index
    %c0_16 = arith.constant 0 : index
    %c0_17 = arith.constant 0 : index
    %16 = vector.load %arg6[%c2_15, %c0_16, %c0_17] : memref<5x128x128xf32, #tpu.memory_space<vmem>>, vector<1x128x128xf32>
    %17 = vector.shape_cast %16 : vector<1x128x128xf32> to vector<128x128xf32>
    %cst_18 = arith.constant dense<0.000000e+00> : vector<8x128xf32>
    %18 = tpu.matmul %15, %17, %cst_18 {dimension_numbers = #tpu.dot_dimension_numbers<[1], [0], [0], [1], [0, 0, 1, 1], [], []>} : vector<8x128xf32>, vector<128x128xf32>, vector<8x128xf32> -> vector<8x128xf32>
    %19 = arith.addf %13, %18 : vector<8x128xf32>
    %c3 = arith.constant 3 : index
    %c0_19 = arith.constant 0 : index
    %c0_20 = arith.constant 0 : index
    %20 = vector.load %arg14[%c3, %c0_19, %c0_20] : memref<5x8x128xf32, #tpu.memory_space<vmem>>, vector<1x8x128xf32>
    %21 = vector.shape_cast %20 : vector<1x8x128xf32> to vector<8x128xf32>
    %c3_21 = arith.constant 3 : index
    %c0_22 = arith.constant 0 : index
    %c0_23 = arith.constant 0 : index
    %22 = vector.load %arg6[%c3_21, %c0_22, %c0_23] : memref<5x128x128xf32, #tpu.memory_space<vmem>>, vector<1x128x128xf32>
    %23 = vector.shape_cast %22 : vector<1x128x128xf32> to vector<128x128xf32>
    %cst_24 = arith.constant dense<0.000000e+00> : vector<8x128xf32>
    %24 = tpu.matmul %21, %23, %cst_24 {dimension_numbers = #tpu.dot_dimension_numbers<[1], [0], [0], [1], [0, 0, 1, 1], [], []>} : vector<8x128xf32>, vector<128x128xf32>, vector<8x128xf32> -> vector<8x128xf32>
    %25 = arith.addf %19, %24 : vector<8x128xf32>
    %c4 = arith.constant 4 : index
    %c0_25 = arith.constant 0 : index
    %c0_26 = arith.constant 0 : index
    %26 = vector.load %arg14[%c4, %c0_25, %c0_26] : memref<5x8x128xf32, #tpu.memory_space<vmem>>, vector<1x8x128xf32>
    %27 = vector.shape_cast %26 : vector<1x8x128xf32> to vector<8x128xf32>
    %c4_27 = arith.constant 4 : index
    %c0_28 = arith.constant 0 : index
    %c0_29 = arith.constant 0 : index
    %28 = vector.load %arg6[%c4_27, %c0_28, %c0_29] : memref<5x128x128xf32, #tpu.memory_space<vmem>>, vector<1x128x128xf32>
    %29 = vector.shape_cast %28 : vector<1x128x128xf32> to vector<128x128xf32>
    %cst_30 = arith.constant dense<0.000000e+00> : vector<8x128xf32>
    %30 = tpu.matmul %27, %29, %cst_30 {dimension_numbers = #tpu.dot_dimension_numbers<[1], [0], [0], [1], [0, 0, 1, 1], [], []>} : vector<8x128xf32>, vector<128x128xf32>, vector<8x128xf32> -> vector<8x128xf32>
    %31 = arith.addf %25, %30 : vector<8x128xf32>
    %c0_31 = arith.constant 0 : index
    %c0_32 = arith.constant 0 : index
    %32 = vector.load %arg7[%c0_31, %c0_32] : memref<1x128xf32, #tpu.memory_space<vmem>>, vector<1x128xf32>
    %33 = vector.broadcast %32 : vector<1x128xf32> to vector<8x128xf32>
    %34 = arith.addf %31, %33 : vector<8x128xf32>
    %cst_33 = arith.constant 0.000000e+00 : f32
    %35 = vector.broadcast %cst_33 : f32 to vector<8x128xf32>
    %36 = arith.maximumf %34, %35 : vector<8x128xf32>
    %c0_34 = arith.constant 0 : index
    %c0_35 = arith.constant 0 : index
    %37 = vector.load %arg8[%c0_34, %c0_35] : memref<128x128xf32, #tpu.memory_space<vmem>>, vector<128x128xf32>
    %cst_36 = arith.constant dense<0.000000e+00> : vector<8x128xf32>
    %38 = tpu.matmul %36, %37, %cst_36 {dimension_numbers = #tpu.dot_dimension_numbers<[1], [0], [0], [1], [0, 0, 1, 1], [], []>} : vector<8x128xf32>, vector<128x128xf32>, vector<8x128xf32> -> vector<8x128xf32>
    %c0_37 = arith.constant 0 : index
    %c0_38 = arith.constant 0 : index
    %39 = vector.load %arg9[%c0_37, %c0_38] : memref<1x128xf32, #tpu.memory_space<vmem>>, vector<1x128xf32>
    %40 = vector.broadcast %39 : vector<1x128xf32> to vector<8x128xf32>
    %41 = arith.addf %38, %40 : vector<8x128xf32>
    %cst_39 = arith.constant 0.000000e+00 : f32
    %42 = vector.broadcast %cst_39 : f32 to vector<8x128xf32>
    %43 = arith.maximumf %41, %42 : vector<8x128xf32>
    %c0_40 = arith.constant 0 : index
    %c0_41 = arith.constant 0 : index
    %44 = vector.load %arg10[%c0_40, %c0_41] : memref<128x128xf32, #tpu.memory_space<vmem>>, vector<128x128xf32>
    %cst_42 = arith.constant dense<0.000000e+00> : vector<8x128xf32>
    %45 = tpu.matmul %43, %44, %cst_42 {dimension_numbers = #tpu.dot_dimension_numbers<[1], [0], [0], [1], [0, 0, 1, 1], [], []>} : vector<8x128xf32>, vector<128x128xf32>, vector<8x128xf32> -> vector<8x128xf32>
    %c0_43 = arith.constant 0 : index
    %c0_44 = arith.constant 0 : index
    %46 = vector.load %arg11[%c0_43, %c0_44] : memref<1x128xf32, #tpu.memory_space<vmem>>, vector<1x128xf32>
    %47 = vector.broadcast %46 : vector<1x128xf32> to vector<8x128xf32>
    %48 = arith.addf %45, %47 : vector<8x128xf32>
    %c0_45 = arith.constant 0 : index
    %c0_46 = arith.constant 0 : index
    %49 = vector.load %arg12[%c0_45, %c0_46] : memref<8x128xf32, #tpu.memory_space<vmem>>, vector<8x128xf32>
    tpu.vector_store %arg12[%c0_45, %c0_46], %48 {strides = array<i32>} : memref<8x128xf32, #tpu.memory_space<vmem>>, vector<8x128xf32>,
    return
  }
  func.func @transform_0(%arg0: i32) -> (i32, i32, i32, i32) {
    %c0_i32 = arith.constant 0 : i32
    %c0_i32_0 = arith.constant 0 : i32
    %c0_i32_1 = arith.constant 0 : i32
    %c0_i32_2 = arith.constant 0 : i32
    return %arg0, %c0_i32, %c0_i32_0, %c0_i32_1 : i32, i32, i32, i32
  }
  func.func @transform_1(%arg0: i32) -> (i32, i32, i32) {
    %c0_i32 = arith.constant 0 : i32
    %c0_i32_0 = arith.constant 0 : i32
    %c0_i32_1 = arith.constant 0 : i32
    %c0_i32_2 = arith.constant 0 : i32
    return %c0_i32, %c0_i32_0, %c0_i32_1 : i32, i32, i32
  }
  func.func @transform_2(%arg0: i32) -> (i32, i32) {
    %c0_i32 = arith.constant 0 : i32
    %c0_i32_0 = arith.constant 0 : i32
    %c0_i32_1 = arith.constant 0 : i32
    return %c0_i32, %c0_i32_0 : i32, i32
  }
  func.func @transform_3(%arg0: i32) -> (i32, i32, i32) {
    %c0_i32 = arith.constant 0 : i32
    %c0_i32_0 = arith.constant 0 : i32
    %c0_i32_1 = arith.constant 0 : i32
    %c0_i32_2 = arith.constant 0 : i32
    return %c0_i32, %c0_i32_0, %c0_i32_1 : i32, i32, i32
  }
  func.func @transform_4(%arg0: i32) -> (i32, i32) {
    %c0_i32 = arith.constant 0 : i32
    %c0_i32_0 = arith.constant 0 : i32
    %c0_i32_1 = arith.constant 0 : i32
    return %c0_i32, %c0_i32_0 : i32, i32
  }
  func.func @transform_5(%arg0: i32) -> (i32, i32, i32) {
    %c0_i32 = arith.constant 0 : i32
    %c0_i32_0 = arith.constant 0 : i32
    %c0_i32_1 = arith.constant 0 : i32
    %c0_i32_2 = arith.constant 0 : i32
    return %c0_i32, %c0_i32_0, %c0_i32_1 : i32, i32, i32
  }
  func.func @transform_6(%arg0: i32) -> (i32, i32) {
    %c0_i32 = arith.constant 0 : i32
    %c0_i32_0 = arith.constant 0 : i32
    %c0_i32_1 = arith.constant 0 : i32
    return %c0_i32, %c0_i32_0 : i32, i32
  }
  func.func @transform_7(%arg0: i32) -> (i32, i32) {
    %c0_i32 = arith.constant 0 : i32
    %c0_i32_0 = arith.constant 0 : i32
    %c0_i32_1 = arith.constant 0 : i32
    return %c0_i32, %c0_i32_0 : i32, i32
  }
  func.func @transform_8(%arg0: i32) -> (i32, i32) {
    %c0_i32 = arith.constant 0 : i32
    %c0_i32_0 = arith.constant 0 : i32
    %c0_i32_1 = arith.constant 0 : i32
    return %c0_i32, %c0_i32_0 : i32, i32
  }
  func.func @transform_9(%arg0: i32) -> (i32, i32) {
    %c0_i32 = arith.constant 0 : i32
    %c0_i32_0 = arith.constant 0 : i32
    %c0_i32_1 = arith.constant 0 : i32
    return %c0_i32, %c0_i32_0 : i32, i32
  }
  func.func @transform_10(%arg0: i32) -> (i32, i32) {
    %c0_i32 = arith.constant 0 : i32
    %c0_i32_0 = arith.constant 0 : i32
    %c0_i32_1 = arith.constant 0 : i32
    return %c0_i32, %c0_i32_0 : i32, i32
  }
  func.func @transform_11(%arg0: i32) -> (i32, i32) {
    %c0_i32 = arith.constant 0 : i32
    %c0_i32_0 = arith.constant 0 : i32
    return %arg0, %c0_i32 : i32, i32
  }
}

</mosaic_0001>

<bundles_post_ra>
// kernel: lenet_forward.1
= control target key start
LH: loop header
LB: loop body
LE: loop exit
PB: predicated region body
PF: predicated region fallthrough
CT: control target
= control target key end

     0   :  { %16 = vsyncpa [#allocation5], 0  ;;  %s4239_s17 = smov 0   ;;  %s5637_s0 = inlined_call_operand.vmem [shape: f32[8,2,16,96], index: 0, kind: input, shape index: {}]   ;;  %s5638_s1 = inlined_call_operand.vmem [shape: f32[5,96,256], index: 1, kind: input, shape index: {}]   ;;  %s5639_s2 = inlined_call_operand.vmem [shape: f32[1,128], index: 2, kind: input, shape index: {}]   ;;  %s5640_s3 = inlined_call_operand.vmem [shape: f32[5,128,256], index: 3, kind: input, shape index: {}]   ;;  %s5641_s4 = inlined_call_operand.vmem [shape: f32[1,128], index: 4, kind: input, shape index: {}]   ;;  %s5642_s5 = inlined_call_operand.vmem [shape: f32[5,128,128], index: 5, kind: input, shape index: {}]   ;;  %s5643_s6 = inlined_call_operand.vmem [shape: f32[1,128], index: 6, kind: input, shape index: {}]   ;;  %s5644_s7 = inlined_call_operand.vmem [shape: f32[128,128], index: 7, kind: input, shape index: {}]   ;;  %s5645_s8 = inlined_call_operand.vmem [shape: f32[1,128], index: 8, kind: input, shape index: {}]   ;;  %s5646_s9 = inlined_call_operand.vmem [shape: f32[128,128], index: 9, kind: input, shape index: {}]   ;;  %s5647_s10 = inlined_call_operand.vmem [shape: f32[1,128], index: 10, kind: input, shape index: {}]   ;;  %s5648_s11 = inlined_call_operand.hbm [shape: f32[8,128], index: 11, kind: output, shape index: {}]  }
   0x1 LB: > { %v2668_v0 = vld [vmem:[%s5638_s1 + $0xc8] sm:$0xff]  ;;  %v2670_v1 = vld [vmem:[%s5638_s1 + $0xd8] sm:$0xff]  ;;  %v2667_v2 = vld [vmem:[%s5638_s1 + $0xc0] sm:$0xff]  ;;  %v4173_v7 = vmov 0.0   ;;  %s2663_s15 = sshll.u32 %s4171_s17, 5  ;;  %vm104_vm0 = vcmask 785408   ;;  %s4171_s17 = sphi %s4239_s17, %s44_s17  }
   0x2   : > { %v3351_v3 = vpack.c.bf16 %v2670_v1, %v2668_v0  ;;  %v2669_v4 = vld [vmem:[%s5638_s1 + $0xd0] sm:$0xff]  ;;  %v2672_v5 = vld [vmem:[%s5638_s1 + $0xe8] sm:$0xff]  ;;  %v2674_v6 = vld [vmem:[%s5638_s1 + $0xf8] sm:$0xff]  ;;  %175 = vmatprep.mubr.f32.mxu0 %v4173_v7  ;;  %341 = vmatprep.mubr.f32.mxu1 %v4173_v7  ;;  %s4328_s19 = scalar_lea.vmem %s5637_s0, %s2663_s15  ;;  %s1989_s22 = scalar_lea.vmem [#allocation3], %s4171_s17 }
   0x3   : > { %v3353_v8 = vpack.c.bf16 %v2669_v4, %v2667_v2  ;;  %v3355_v9 = vpack.c.bf16 %v2674_v6, %v2672_v5  ;;  %v2671_v10 = vld [vmem:[%s5638_s1 + $0xe0] sm:$0xff]  ;;  %v2673_v11 = vld [vmem:[%s5638_s1 + $0xf0] sm:$0xff]  ;;  %v2676_v12 = vld [vmem:[%s5638_s1 + $0x108] sm:$0xff]  ;;  %s44_s17 = sadd.s32 1, %s4171_s17  }
   0x4   : > { %3352 = vmatprep.subr.bf16.mxu0 %v3351_v3  ;;  %3400 = vmatprep.subr.bf16.mxu1 %v3351_v3  ;;  %v2678_v13 = vld [vmem:[%s5638_s1 + $0x118] sm:$0xff]  ;;  %v3357_v14 = vpack.c.bf16 %v2673_v11, %v2671_v10  ;;  %v2675_v16 = vld [vmem:[%s5638_s1 + $0x100] sm:$0xff]  ;;  %v2677_v17 = vld [vmem:[%s5638_s1 + $0x110] sm:$0xff]  ;;  %p41_p0 = scmp.ge.s32.totalorder %s44_s17, 8  }
   0x5   : > { %3354 = vmatpush1.bf16.msra.mxu0 %v3353_v8  ;;  %3402 = vmatpush1.bf16.msra.mxu1 %v3353_v8  ;;  %v3359_v15 = vpack.c.bf16 %v2678_v13, %v2676_v12  ;;  %v2680_v18 = vld [vmem:[%s5638_s1 + $0x128] sm:$0xff]  ;;  %v2682_v19 = vld [vmem:[%s5638_s1 + $0x138] sm:$0xff]  ;;  %v3361_v20 = vpack.c.bf16 %v2677_v17, %v2675_v16  ;;  %v2679_v22 = vld [vmem:[%s5638_s1 + $0x120] sm:$0xff]  ;;  %vm4176_vm1 = vmmov (%p41_p0), 0   ;;  %s4178_s0 = smov (%p41_p0), [#allocation4]  }
   0x6   : > { %3356 = vmatprep.subr.bf16.mxu0 %v3355_v9  ;;  %3404 = vmatprep.subr.bf16.mxu1 %v3355_v9  ;;  %v3363_v21 = vpack.c.bf16 %v2682_v19, %v2680_v18  ;;  %v2681_v23 = vld [vmem:[%s5638_s1 + $0x130] sm:$0xff]  ;;  %v2684_v24 = vld [vmem:[%s5638_s1 + $0x148] sm:$0xff]  ;;  %v2686_v25 = vld [vmem:[%s5638_s1 + $0x158] sm:$0xff] }
   0x7   : > { %v3365_v26 = vpack.c.bf16 %v2681_v23, %v2679_v22  ;;  %v3367_v27 = vpack.c.bf16 %v2686_v25, %v2684_v24  ;;  %v2683_v28 = vld [vmem:[%s5638_s1 + $0x140] sm:$0xff]  ;;  %v2685_v29 = vld [vmem:[%s5638_s1 + $0x150] sm:$0xff]  ;;  %v2688_v30 = vld [vmem:[%s5638_s1 + $0x168] sm:$0xff] }
   0x8   : > { %v2690_v31 = vld [vmem:[%s5638_s1 + $0x178] sm:$0xff]  ;;  %v3369_v32 = vpack.c.bf16 %v2685_v29, %v2683_v28  ;;  %v2687_v34 = vld [vmem:[%s5638_s1 + $0x160] sm:$0xff]  ;;  %v2689_v35 = vld [vmem:[%s5638_s1 + $0x170] sm:$0xff] }
   0x9   : > { %3358 = vmatpush1.bf16.msra.mxu0 %v3357_v14  ;;  %3406 = vmatpush1.bf16.msra.mxu1 %v3357_v14  ;;  %v3371_v33 = vpack.c.bf16 %v2690_v31, %v2688_v30  ;;  %v54_v36 = vld [vmem:[%s5638_s1 + $0x8] sm:$0xff]  ;;  %v56_v37 = vld [vmem:[%s5638_s1 + $0x18] sm:$0xff]  ;;  %v3373_v38 = vpack.c.bf16 %v2689_v35, %v2687_v34  ;;  %v53_v40 = vld [vmem:[%s5638_s1] sm:$0xff] }
   0xa   : > { %3360 = vmatprep.subr.bf16.mxu0 %v3359_v15  ;;  %3408 = vmatprep.subr.bf16.mxu1 %v3359_v15  ;;  %v3375_v39 = vpack.c.bf16 %v56_v37, %v54_v36  ;;  %v55_v41 = vld [vmem:[%s5638_s1 + $0x10] sm:$0xff]  ;;  %v58_v42 = vld [vmem:[%s5638_s1 + $0x28] sm:$0xff]  ;;  %v60_v43 = vld [vmem:[%s5638_s1 + $0x38] sm:$0xff] }
   0xb   : > { %v4343_v44 = vld [vmem:[%s4328_s19 + $0x10] sm:$0xff]  ;;  %v3377_v45 = vpack.c.bf16 %v55_v41, %v53_v40  ;;  %v4346_v46 = vld [vmem:[%s4328_s19 + $0x1] sm:$0xff]  ;;  %v3379_v47 = vpack.c.bf16 %v60_v43, %v58_v42  ;;  %v64_v51 = vld [vmem:[%s5638_s1 + $0x58] sm:$0xff] }
   0xc   : > { %v57_v48 = vld [vmem:[%s5638_s1 + $0x20] sm:$0xff]  ;;  %v59_v49 = vld [vmem:[%s5638_s1 + $0x30] sm:$0xff]  ;;  %v62_v50 = vld [vmem:[%s5638_s1 + $0x48] sm:$0xff] }
   0xd   : > { %3362 = vmatpush1.bf16.msra.mxu0 %v3361_v20  ;;  %3410 = vmatpush1.bf16.msra.mxu1 %v3361_v20  ;;  %v3381_v52 = vpack.c.bf16 %v59_v49, %v57_v48  ;;  %v4365_v53 = vld [vmem:[%s4328_s19 + $0x18] sm:$0x3f]  ;;  %v4368_v54 = vld [vmem:[%s4328_s19 + $0x9] sm:$0x3f]  ;;  %v3383_v55 = vpack.c.bf16 %v64_v51, %v62_v50  ;;  %v61_v56 = vld [vmem:[%s5638_s1 + $0x40] sm:$0xff] }
   0xe   : > { %3364 = vmatprep.subr.bf16.mxu0 %v3363_v21  ;;  %3412 = vmatprep.subr.bf16.mxu1 %v3363_v21  ;;  %v63_v57 = vld [vmem:[%s5638_s1 + $0x50] sm:$0xff]  ;;  %v66_v58 = vld [vmem:[%s5638_s1 + $0x68] sm:$0xff]  ;;  %v68_v59 = vld [vmem:[%s5638_s1 + $0x78] sm:$0xff] }
   0xf   : > { %v3385_v60 = vpack.c.bf16 %v63_v57, %v61_v56  ;;  %v3387_v61 = vpack.c.bf16 %v68_v59, %v66_v58  ;;  %v65_v62 = vld [vmem:[%s5638_s1 + $0x60] sm:$0xff]  ;;  %v67_v63 = vld [vmem:[%s5638_s1 + $0x70] sm:$0xff]  ;;  %v70_v0 = vld [vmem:[%s5638_s1 + $0x88] sm:$0xff] }
  0x10   : > { %v72_v1 = vld [vmem:[%s5638_s1 + $0x98] sm:$0xff]  ;;  %v3389_v2 = vpack.c.bf16 %v67_v63, %v65_v62  ;;  %v69_v4 = vld [vmem:[%s5638_s1 + $0x80] sm:$0xff]  ;;  %v71_v5 = vld [vmem:[%s5638_s1 + $0x90] sm:$0xff] }
  0x11   : > { %3366 = vmatpush1.bf16.msra.mxu0 %v3365_v26  ;;  %3414 = vmatpush1.bf16.msra.mxu1 %v3365_v26  ;;  %v3391_v3 = vpack.c.bf16 %v72_v1, %v70_v0  ;;  %v74_v6 = vld [vmem:[%s5638_s1 + $0xa8] sm:$0xff]  ;;  %v76_v8 = vld [vmem:[%s5638_s1 + $0xb8] sm:$0xff]  ;;  %v3393_v9 = vpack.c.bf16 %v71_v5, %v69_v4  ;;  %v73_v11 = vld [vmem:[%s5638_s1 + $0xa0] sm:$0xff] }
  0x12   : > { %3368 = vmatprep.subr.bf16.mxu0 %v3367_v27  ;;  %3416 = vmatprep.subr.bf16.mxu1 %v3367_v27  ;;  %v3395_v10 = vpack.c.bf16 %v76_v8, %v74_v6  ;;  %v75_v12 = vld [vmem:[%s5638_s1 + $0xb0] sm:$0xff]  ;;  %v2702_v13 = vld [vmem:[%s5638_s1 + $0x188] sm:$0xff]  ;;  %v2704_v14 = vld [vmem:[%s5638_s1 + $0x198] sm:$0xff] }
  0x13   : > { %v3397_v15 = vpack.c.bf16 %v75_v12, %v73_v11  ;;  %v3447_v16 = vpack.c.bf16 %v2704_v14, %v2702_v13  ;;  %v2701_v17 = vld [vmem:[%s5638_s1 + $0x180] sm:$0xff]  ;;  %v2703_v18 = vld [vmem:[%s5638_s1 + $0x190] sm:$0xff]  ;;  %v2706_v19 = vld [vmem:[%s5638_s1 + $0x1a8] sm:$0xff] }
  0x14   : > { %v2708_v20 = vld [vmem:[%s5638_s1 + $0x1b8] sm:$0xff]  ;;  %v47_v21 = vld [vmem:[%s4328_s19] sm:$0xff]  ;;  %v3449_v22 = vpack.c.bf16 %v2703_v18, %v2701_v17  ;;  %v2707_v25 = vld [vmem:[%s5638_s1 + $0x1b0] sm:$0xff] }
  0x15   : > { %3370 = vmatpush1.bf16.msra.mxu0 %v3369_v32  ;;  %3418 = vmatpush1.bf16.msra.mxu1 %v3369_v32  ;;  %v3451_v23 = vpack.c.bf16 %v2708_v20, %v2706_v19  ;;  %v2705_v24 = vld [vmem:[%s5638_s1 + $0x1a0] sm:$0xff]  ;;  %v2710_v26 = vld [vmem:[%s5638_s1 + $0x1c8] sm:$0xff]  ;;  %v2712_v27 = vld [vmem:[%s5638_s1 + $0x1d8] sm:$0xff] }
  0x16   : > { %3372 = vmatprep.subr.bf16.mxu0 %v3371_v33  ;;  %3420 = vmatprep.subr.bf16.mxu1 %v3371_v33  ;;  %v3453_v28 = vpack.c.bf16 %v2707_v25, %v2705_v24  ;;  %v48_v29 = vld [vmem:[%s4328_s19 + $0x8] sm:$0x3f]  ;;  %v3455_v30 = vpack.c.bf16 %v2712_v27, %v2710_v26  ;;  %v2709_v31 = vld [vmem:[%s5638_s1 + $0x1c0] sm:$0xff]  ;;  %v2711_v32 = vld [vmem:[%s5638_s1 + $0x1d0] sm:$0xff] }
  0x17   : > { %v2714_v33 = vld [vmem:[%s5638_s1 + $0x1e8] sm:$0xff]  ;;  %v2716_v34 = vld [vmem:[%s5638_s1 + $0x1f8] sm:$0xff]  ;;  %v3457_v35 = vpack.c.bf16 %v2711_v32, %v2709_v31  ;;  %v2713_v37 = vld [vmem:[%s5638_s1 + $0x1e0] sm:$0xff] }
  0x18   : > { %v3459_v36 = vpack.c.bf16 %v2716_v34, %v2714_v33  ;;  %v2720_v40 = vld [vmem:[%s5638_s1 + $0x218] sm:$0xff]  ;;  %v2717_v43 = vld [vmem:[%s5638_s1 + $0x200] sm:$0xff]  ;;  %v2723_v51 = vld [vmem:[%s5638_s1 + $0x230] sm:$0xff] }
  0x19   : > { %3374 = vmatpush1.bf16.msra.mxu0 %v3373_v38  ;;  %3422 = vmatpush1.bf16.msra.mxu1 %v3373_v38  ;;  %v2715_v38 = vld [vmem:[%s5638_s1 + $0x1f0] sm:$0xff]  ;;  %v2721_v50 = vld [vmem:[%s5638_s1 + $0x220] sm:$0xff]  ;;  %v2734_v59 = vld [vmem:[%s5638_s1 + $0x268] sm:$0xff] }
  0x1a   : > { %3376 = vmatprep.subr.bf16.mxu0 %v3375_v39  ;;  %3424 = vmatprep.subr.bf16.mxu1 %v3375_v39  ;;  %v2718_v39 = vld [vmem:[%s5638_s1 + $0x208] sm:$0xff]  ;;  %v3461_v41 = vpack.c.bf16 %v2715_v38, %v2713_v37  ;;  %v2729_v57 = vld [vmem:[%s5638_s1 + $0x240] sm:$0xff]  ;;  %v2731_v58 = vld [vmem:[%s5638_s1 + $0x250] sm:$0xff] }
  0x1b   : > { %v3463_v42 = vpack.c.bf16 %v2720_v40, %v2718_v39  ;;  %v3497_v62 = vpack.c.bf16 %v2731_v58, %v2729_v57  ;;  %v2733_v0 = vld [vmem:[%s5638_s1 + $0x260] sm:$0xff]  ;;  %v2735_v1 = vld [vmem:[%s5638_s1 + $0x270] sm:$0xff]  ;;  %v4542_v5 = vld [vmem:[%s4328_s19 + $0x19] sm:$0x3f] }
  0x1c   : > { %2691 = vmatmul.mubr.msk.f32.vlgmr.msra.gmra.mrb[0].mxu0 %vm104_vm0, %v4343_v44  ;;  %2695 = vmatmul.mubr.msk.f32.vlgmr.msra.gmra.mrb[0].mxu1 %vm104_vm0, %v4346_v46  ;;  %v3501_v4 = vpack.c.bf16 %v2735_v1, %v2733_v0  ;;  %v2737_v8 = vld [vmem:[%s5638_s1 + $0x280] sm:$0xff]  ;;  %v2743_v14 = vld [vmem:[%s5638_s1 + $0x2b0] sm:$0xff]  ;;  %v2750_v20 = vld [vmem:[%s5638_s1 + $0x2e8] sm:$0xff] }
  0x1d   : > { %3378 = vmatpush1.bf16.msra.mxu0 %v3377_v45  ;;  %3426 = vmatpush1.bf16.msra.mxu1 %v3377_v45  ;;  %v2722_v45 = vld [vmem:[%s5638_s1 + $0x228] sm:$0xff]  ;;  %v2741_v13 = vld [vmem:[%s5638_s1 + $0x2a0] sm:$0xff]  ;;  %v2747_v19 = vld [vmem:[%s5638_s1 + $0x2d0] sm:$0xff] }
  0x1e   : > { %3380 = vmatprep.subr.bf16.mxu0 %v3379_v47  ;;  %3428 = vmatprep.subr.bf16.mxu1 %v3379_v47  ;;  %v2724_v47 = vld [vmem:[%s5638_s1 + $0x238] sm:$0xff]  ;;  %v2745_v18 = vld [vmem:[%s5638_s1 + $0x2c0] sm:$0xff]  ;;  %v2751_v25 = vld [vmem:[%s5638_s1 + $0x2f0] sm:$0xff] }
  0x1f   : > { %181 = vmatprep.mubr.f32.mxu0 %v4173_v7  ;;  %347 = vmatprep.mubr.f32.mxu1 %v4173_v7  ;;  %v3467_v49 = vpack.c.bf16 %v2724_v47, %v2722_v45  ;;  %v2749_v24 = vld [vmem:[%s5638_s1 + $0x2e0] sm:$0xff]  ;;  %v2760_v26 = vld [vmem:[%s5638_s1 + $0x308] sm:$0xff]  ;;  %v2762_v27 = vld [vmem:[%s5638_s1 + $0x318] sm:$0xff] }
  0x20   : > { %2692 = vmatmul.mubr.msk.f32.gmra.mrb[2].mxu0 %vm104_vm0, %v4365_v53  ;;  %2696 = vmatmul.mubr.msk.f32.gmra.mrb[2].mxu1 %vm104_vm0, %v4368_v54  ;;  %v2761_v31 = vld [vmem:[%s5638_s1 + $0x310] sm:$0xff]  ;;  %v2764_v32 = vld [vmem:[%s5638_s1 + $0x328] sm:$0xff]  ;;  %v2766_v33 = vld [vmem:[%s5638_s1 + $0x338] sm:$0xff] }
  0x21   : > { %3382 = vmatpush1.bf16.msra.mxu0 %v3381_v52  ;;  %3430 = vmatpush1.bf16.msra.mxu1 %v3381_v52  ;;  %v2730_v52 = vld [vmem:[%s5638_s1 + $0x248] sm:$0xff]  ;;  %v2763_v37 = vld [vmem:[%s5638_s1 + $0x320] sm:$0xff]  ;;  %v2765_v38 = vld [vmem:[%s5638_s1 + $0x330] sm:$0xff] }
  0x22   : > { %3384 = vmatprep.subr.bf16.mxu0 %v3383_v55  ;;  %3432 = vmatprep.subr.bf16.mxu1 %v3383_v55  ;;  %v3469_v55 = vpack.c.bf16 %v2723_v51, %v2721_v50  ;;  %v4613_v34 = vld [vmem:[%s4328_s19 + $0x2] sm:$0xff]  ;;  %v2770_v40 = vld [vmem:[%s5638_s1 + $0x358] sm:$0xff]  ;;  %v2769_v45 = vld [vmem:[%s5638_s1 + $0x350] sm:$0xff] }
  0x23   : > { %258 = vmatprep.mubr.f32.mxu0 %v4173_v7  ;;  %418 = vmatprep.mubr.f32.mxu1 %v4173_v7  ;;  %v2768_v39 = vld [vmem:[%s5638_s1 + $0x348] sm:$0xff]  ;;  %v2771_v51 = vld [vmem:[%s5638_s1 + $0x360] sm:$0xff]  ;;  %v2781_v1 = vld [vmem:[%s5638_s1 + $0x3b0] sm:$0xff] }
  0x24   : > { %v2772_v47 = vld [vmem:[%s5638_s1 + $0x368] sm:$0xff]  ;;  %v2775_v58 = vld [vmem:[%s5638_s1 + $0x380] sm:$0xff] }
  0x25   : > { %3386 = vmatpush1.bf16.msra.mxu0 %v3385_v60  ;;  %3434 = vmatpush1.bf16.msra.mxu1 %v3385_v60  ;;  %v2736_v60 = vld [vmem:[%s5638_s1 + $0x278] sm:$0xff]  ;;  %v2779_v0 = vld [vmem:[%s5638_s1 + $0x3a0] sm:$0xff] }
  0x26   : > { %3388 = vmatprep.subr.bf16.mxu0 %v3387_v61  ;;  %3436 = vmatprep.subr.bf16.mxu1 %v3387_v61  ;;  %v4523_v61 = vld [vmem:[%s4328_s19 + $0x11] sm:$0xff]  ;;  %v3499_v63 = vpack.c.bf16 %v2736_v60, %v2734_v59  ;;  %v2780_v60 = vld [vmem:[%s5638_s1 + $0x3a8] sm:$0xff] }
  0x27   : > { %v2777_v59 = vld [vmem:[%s5638_s1 + $0x390] sm:$0xff] }
  0x29   : > { %3390 = vmatpush1.bf16.msra.mxu0 %v3389_v2  ;;  %3438 = vmatpush1.bf16.msra.mxu1 %v3389_v2  ;;  %v2738_v2 = vld [vmem:[%s5638_s1 + $0x288] sm:$0xff] }
  0x2a   : > { %3392 = vmatprep.subr.bf16.mxu0 %v3391_v3  ;;  %3440 = vmatprep.subr.bf16.mxu1 %v3391_v3  ;;  %v2740_v3 = vld [vmem:[%s5638_s1 + $0x298] sm:$0xff] }
  0x2b   : > { %v3503_v6 = vpack.c.bf16 %v2740_v3, %v2738_v2  ;;  %v2789_v2 = vld [vmem:[%s5640_s3 + $0x108] sm:$0xff]  ;;  %v2791_v3 = vld [vmem:[%s5640_s3 + $0x118] sm:$0xff] }
  0x2d   : > { %3394 = vmatpush1.bf16.msra.mxu0 %v3393_v9  ;;  %3442 = vmatpush1.bf16.msra.mxu1 %v3393_v9  ;;  %v2739_v9 = vld [vmem:[%s5638_s1 + $0x290] sm:$0xff] }
  0x2e   : > { %3396 = vmatprep.subr.bf16.mxu0 %v3395_v10  ;;  %3444 = vmatprep.subr.bf16.mxu1 %v3395_v10  ;;  %v2744_v10 = vld [vmem:[%s5638_s1 + $0x2b8] sm:$0xff]  ;;  %v3505_v11 = vpack.c.bf16 %v2739_v9, %v2737_v8  ;;  %v2790_v8 = vld [vmem:[%s5640_s3 + $0x110] sm:$0xff]  ;;  %v2793_v9 = vld [vmem:[%s5640_s3 + $0x128] sm:$0xff] }
  0x31   : > { %3398 = vmatpush1.bf16.msra.mxu0 %v3397_v15  ;;  %3446 = vmatpush1.bf16.msra.mxu1 %v3397_v15  ;;  %v2748_v15 = vld [vmem:[%s5638_s1 + $0x2d8] sm:$0xff] }
  0x32   : > { %3448 = vmatprep.subr.bf16.mxu0 %v3447_v16  ;;  %3472 = vmatprep.subr.bf16.mxu1 %v3447_v16  ;;  %v3509_v16 = vpack.c.bf16 %v2743_v14, %v2741_v13  ;;  %v2792_v13 = vld [vmem:[%s5640_s3 + $0x120] sm:$0xff]  ;;  %v2794_v14 = vld [vmem:[%s5640_s3 + $0x130] sm:$0xff] }
  0x34   : > { %2693 = vmatmul.mubr.msk.f32.vlgmr.msra.gmra.mrb[0].mxu0 %vm104_vm0, %v47_v21  ;;  %2697 = vmatmul.mubr.msk.f32.vlgmr.msra.gmra.mrb[0].mxu1 %vm104_vm0, %v4343_v44  ;;  %v2719_v44 = vld [vmem:[%s5638_s1 + $0x210] sm:$0xff]  ;;  %v2752_v21 = vld [vmem:[%s5638_s1 + $0x2f8] sm:$0xff] }
  0x35   : > { %3450 = vmatpush1.bf16.msra.mxu0 %v3449_v22  ;;  %3474 = vmatpush1.bf16.msra.mxu1 %v3449_v22  ;;  %v3465_v48 = vpack.c.bf16 %v2719_v44, %v2717_v43  ;;  %v3513_v22 = vpack.c.bf16 %v2747_v19, %v2745_v18  ;;  %v3551_v43 = vpack.c.bf16 %v2770_v40, %v2768_v39  ;;  %v2767_v44 = vld [vmem:[%s5638_s1 + $0x340] sm:$0xff]  ;;  %v2813_v40 = vld [vmem:[%s5640_s3 + $0x1c8] sm:$0xff] }
  0x36   : > { %3452 = vmatprep.subr.bf16.mxu0 %v3451_v23  ;;  %3476 = vmatprep.subr.bf16.mxu1 %v3451_v23  ;;  %v3515_v23 = vpack.c.bf16 %v2752_v21, %v2750_v20  ;;  %v2796_v19 = vld [vmem:[%s5640_s3 + $0x140] sm:$0xff]  ;;  %v2798_v20 = vld [vmem:[%s5640_s3 + $0x150] sm:$0xff] }
  0x37   : > { %264 = vmatprep.mubr.f32.mxu0 %v4173_v7  ;;  %424 = vmatprep.mubr.f32.mxu1 %v4173_v7  ;;  %v3601_v21 = vpack.c.bf16 %v2798_v20, %v2796_v19  ;;  %v1047_v19 = vld [vmem:[%s5640_s3 + $0x48] sm:$0xff]  ;;  %v1049_v20 = vld [vmem:[%s5640_s3 + $0x58] sm:$0xff] }
  0x38   : > { %2694 = vmatmul.mubr.msk.f32.gmra.mrb[2].mxu0 %vm104_vm0, %v48_v29  ;;  %2698 = vmatmul.mubr.msk.f32.gmra.mrb[2].mxu1 %vm104_vm0, %v4365_v53  ;;  %v2732_v53 = vld [vmem:[%s5638_s1 + $0x258] sm:$0xff]  ;;  %v3543_v29 = vpack.c.bf16 %v2762_v27, %v2760_v26  ;;  %v2802_v26 = vld [vmem:[%s5640_s3 + $0x170] sm:$0xff] }
  0x39   : > { %3454 = vmatpush1.bf16.msra.mxu0 %v3453_v28  ;;  %3478 = vmatpush1.bf16.msra.mxu1 %v3453_v28  ;;  %v3495_v56 = vpack.c.bf16 %v2732_v53, %v2730_v52  ;;  %v3517_v28 = vpack.c.bf16 %v2751_v25, %v2749_v24  ;;  %v2773_v52 = vld [vmem:[%s5638_s1 + $0x370] sm:$0xff]  ;;  %v2776_v53 = vld [vmem:[%s5638_s1 + $0x388] sm:$0xff]  ;;  %v2800_v25 = vld [vmem:[%s5640_s3 + $0x160] sm:$0xff] }
  0x3a   : > { %3456 = vmatprep.subr.bf16.mxu0 %v3455_v30  ;;  %3480 = vmatprep.subr.bf16.mxu1 %v3455_v30  ;;  %v2759_v30 = vld [vmem:[%s5638_s1 + $0x300] sm:$0xff]  ;;  %v3605_v27 = vpack.c.bf16 %v2802_v26, %v2800_v25  ;;  %v1048_v26 = vld [vmem:[%s5640_s3 + $0x50] sm:$0xff] }
  0x3b   : > { %522 = vmatprep.mubr.f32.mxu0 %v4173_v7  ;;  %609 = vmatprep.mubr.f32.mxu1 %v4173_v7  ;;  %v1046_v25 = vld [vmem:[%s5640_s3 + $0x40] sm:$0xff] }
  0x3d   : > { %3458 = vmatpush1.bf16.msra.mxu0 %v3457_v35  ;;  %3482 = vmatpush1.bf16.msra.mxu1 %v3457_v35  ;;  %v3545_v35 = vpack.c.bf16 %v2761_v31, %v2759_v30  ;;  %v2804_v31 = vld [vmem:[%s5640_s3 + $0x180] sm:$0xff] }
  0x3e   : > { %3460 = vmatprep.subr.bf16.mxu0 %v3459_v36  ;;  %3484 = vmatprep.subr.bf16.mxu1 %v3459_v36  ;;  %v3547_v36 = vpack.c.bf16 %v2766_v33, %v2764_v32  ;;  %v2806_v32 = vld [vmem:[%s5640_s3 + $0x190] sm:$0xff] }
  0x3f   : > { %v3609_v33 = vpack.c.bf16 %v2806_v32, %v2804_v31  ;;  %v1050_v31 = vld [vmem:[%s5640_s3 + $0x60] sm:$0xff]  ;;  %v1052_v32 = vld [vmem:[%s5640_s3 + $0x70] sm:$0xff] }
  0x41   : > { %3462 = vmatpush1.bf16.msra.mxu0 %v3461_v41  ;;  %3486 = vmatpush1.bf16.msra.mxu1 %v3461_v41  ;;  %v3549_v41 = vpack.c.bf16 %v2765_v38, %v2763_v37  ;;  %v2808_v37 = vld [vmem:[%s5640_s3 + $0x1a0] sm:$0xff]  ;;  %v2810_v38 = vld [vmem:[%s5640_s3 + $0x1b0] sm:$0xff] }
  0x42   : > { %3464 = vmatprep.subr.bf16.mxu0 %v3463_v42  ;;  %3488 = vmatprep.subr.bf16.mxu1 %v3463_v42  ;;  %v4632_v42 = vld [vmem:[%s4328_s19 + $0xa] sm:$0x3f]  ;;  %v3613_v39 = vpack.c.bf16 %v2810_v38, %v2808_v37  ;;  %v1054_v37 = vld [vmem:[%s5640_s3 + $0x80] sm:$0xff]  ;;  %v1056_v38 = vld [vmem:[%s5640_s3 + $0x90] sm:$0xff] }
  0x45   : > { %3466 = vmatpush1.bf16.msra.mxu0 %v3465_v48  ;;  %3490 = vmatpush1.bf16.msra.mxu1 %v3465_v48  ;;  %v2774_v48 = vld [vmem:[%s5638_s1 + $0x378] sm:$0xff] }
  0x46   : > { %3468 = vmatprep.subr.bf16.mxu0 %v3467_v49  ;;  %3492 = vmatprep.subr.bf16.mxu1 %v3467_v49  ;;  %v3553_v49 = vpack.c.bf16 %v2769_v45, %v2767_v44  ;;  %v3555_v50 = vpack.c.bf16 %v2774_v48, %v2772_v47  ;;  %v2814_v44 = vld [vmem:[%s5640_s3 + $0x1d0] sm:$0xff]  ;;  %v2817_v47 = vld [vmem:[%s5640_s3 + $0x1e8] sm:$0xff]  ;;  %v2819_v48 = vld [vmem:[%s5640_s3 + $0x1f8] sm:$0xff] }
  0x49   : > { %3470 = vmatpush1.bf16.msra.mxu0 %v3469_v55  ;;  %3494 = vmatpush1.bf16.msra.mxu1 %v3469_v55  ;;  %v2778_v55 = vld [vmem:[%s5638_s1 + $0x398] sm:$0xff] }
  0x4a   : > { %3496 = vmatprep.subr.bf16.mxu0 %v3495_v56  ;;  %3520 = vmatprep.subr.bf16.mxu1 %v3495_v56  ;;  %v3557_v56 = vpack.c.bf16 %v2773_v52, %v2771_v51  ;;  %v3559_v57 = vpack.c.bf16 %v2778_v55, %v2776_v53  ;;  %v2818_v51 = vld [vmem:[%s5640_s3 + $0x1f0] sm:$0xff]  ;;  %v1039_v52 = vld [vmem:[%s5640_s3 + $0x8] sm:$0xff]  ;;  %v1041_v53 = vld [vmem:[%s5640_s3 + $0x18] sm:$0xff] }
  0x4c   : > { %2725 = vmatmul.mubr.msk.f32.vlgmr.msra.gmra.mrb[0].mxu0 %vm104_vm0, %v4346_v46  ;;  %2727 = vmatmul.mubr.msk.f32.vlgmr.msra.gmra.mrb[0].mxu1 %vm104_vm0, %v4523_v61  ;;  %v2742_v46 = vld [vmem:[%s5638_s1 + $0x2a8] sm:$0xff] }
  0x4d   : > { %3498 = vmatpush1.bf16.msra.mxu0 %v3497_v62  ;;  %3522 = vmatpush1.bf16.msra.mxu1 %v3497_v62  ;;  %v3507_v12 = vpack.c.bf16 %v2744_v10, %v2742_v46  ;;  %v3561_v62 = vpack.c.bf16 %v2777_v59, %v2775_v58  ;;  %v2795_v46 = vld [vmem:[%s5640_s3 + $0x138] sm:$0xff] }
  0x4e   : > { %3500 = vmatprep.subr.bf16.mxu0 %v3499_v63  ;;  %3524 = vmatprep.subr.bf16.mxu1 %v3499_v63  ;;  %v2757_v10 = vld [vmem:[%s4328_s19 + $0x12] sm:$0xff] }
  0x4f   : > { %528 = vmatprep.mubr.f32.mxu0 %v4173_v7  ;;  %615 = vmatprep.mubr.f32.mxu1 %v4173_v7 }
  0x50   : > { %2726 = vmatmul.mubr.msk.f32.gmra.mrb[2].mxu0 %vm104_vm0, %v4368_v54  ;;  %2728 = vmatmul.mubr.msk.f32.gmra.mrb[2].mxu1 %vm104_vm0, %v4542_v5  ;;  %v2746_v54 = vld [vmem:[%s5638_s1 + $0x2c8] sm:$0xff] }
  0x51   : > { %3502 = vmatpush1.bf16.msra.mxu0 %v3501_v4  ;;  %3526 = vmatpush1.bf16.msra.mxu1 %v3501_v4  ;;  %v3511_v17 = vpack.c.bf16 %v2748_v15, %v2746_v54  ;;  %v3565_v4 = vpack.c.bf16 %v2781_v1, %v2779_v0  ;;  %v2797_v54 = vld [vmem:[%s5640_s3 + $0x148] sm:$0xff]  ;;  %v2799_v15 = vld [vmem:[%s5640_s3 + $0x158] sm:$0xff] }
  0x52   : > { %3504 = vmatprep.subr.bf16.mxu0 %v3503_v6  ;;  %3528 = vmatprep.subr.bf16.mxu1 %v3503_v6  ;;  %v2788_v6 = vld [vmem:[%s5640_s3 + $0x100] sm:$0xff]  ;;  %v3599_v18 = vpack.c.bf16 %v2799_v15, %v2797_v54  ;;  %v1045_v54 = vld [vmem:[%s5640_s3 + $0x38] sm:$0xff] }
  0x53   : > { %717 = vmatprep.mubr.f32.mxu0 %v4173_v7  ;;  %804 = vmatprep.mubr.f32.mxu1 %v4173_v7 }
  0x55   : > { %3506 = vmatpush1.bf16.msra.mxu0 %v3505_v11  ;;  %3530 = vmatpush1.bf16.msra.mxu1 %v3505_v11  ;;  %v3593_v11 = vpack.c.bf16 %v2790_v8, %v2788_v6 }
  0x56   : > { %3508 = vmatprep.subr.bf16.mxu0 %v3507_v12  ;;  %3532 = vmatprep.subr.bf16.mxu1 %v3507_v12  ;;  %v3595_v12 = vpack.c.bf16 %v2795_v46, %v2793_v9 }
  0x59   : > { %3510 = vmatpush1.bf16.msra.mxu0 %v3509_v16  ;;  %3534 = vmatpush1.bf16.msra.mxu1 %v3509_v16  ;;  %v2758_v16 = vld [vmem:[%s4328_s19 + $0x1a] sm:$0x3f] }
  0x5a   : > { %3512 = vmatprep.subr.bf16.mxu0 %v3511_v17  ;;  %3536 = vmatprep.subr.bf16.mxu1 %v3511_v17  ;;  %v3597_v17 = vpack.c.bf16 %v2794_v14, %v2792_v13  ;;  %v1040_v13 = vld [vmem:[%s5640_s3 + $0x10] sm:$0xff]  ;;  %v1043_v14 = vld [vmem:[%s5640_s3 + $0x28] sm:$0xff] }
  0x5d   : > { %3514 = vmatpush1.bf16.msra.mxu0 %v3513_v22  ;;  %3538 = vmatpush1.bf16.msra.mxu1 %v3513_v22  ;;  %v2801_v22 = vld [vmem:[%s5640_s3 + $0x168] sm:$0xff] }
  0x5e   : > { %3516 = vmatprep.subr.bf16.mxu0 %v3515_v23  ;;  %3540 = vmatprep.subr.bf16.mxu1 %v3515_v23  ;;  %v2803_v23 = vld [vmem:[%s5640_s3 + $0x178] sm:$0xff] }
  0x5f   : > { %v3603_v24 = vpack.c.bf16 %v2803_v23, %v2801_v22 }
  0x61   : > { %3518 = vmatpush1.bf16.msra.mxu0 %v3517_v28  ;;  %3542 = vmatpush1.bf16.msra.mxu1 %v3517_v28  ;;  %v2805_v28 = vld [vmem:[%s5640_s3 + $0x188] sm:$0xff] }
  0x62   : > { %3544 = vmatprep.subr.bf16.mxu0 %v3543_v29  ;;  %3568 = vmatprep.subr.bf16.mxu1 %v3543_v29  ;;  %v2807_v29 = vld [vmem:[%s5640_s3 + $0x198] sm:$0xff] }
  0x63   : > { %v3607_v30 = vpack.c.bf16 %v2807_v29, %v2805_v28  ;;  %v1053_v28 = vld [vmem:[%s5640_s3 + $0x78] sm:$0xff]  ;;  %v3633_v29 = vpack.c.bf16 %v1048_v26, %v1046_v25  ;;  %v2838_v25 = vld [vmem:[%s5640_s3 + $0x290] sm:$0xff]  ;;  %v2841_v26 = vld [vmem:[%s5640_s3 + $0x2a8] sm:$0xff] }
  0x64   : > { %2753 = vmatmul.mubr.msk.f32.vlgmr.msra.gmra.mrb[0].mxu0 %vm104_vm0, %v4523_v61  ;;  %2755 = vmatmul.mubr.msk.f32.vlgmr.msra.gmra.mrb[0].mxu1 %vm104_vm0, %v4613_v34  ;;  %v2782_v61 = vld [vmem:[%s5638_s1 + $0x3b8] sm:$0xff]  ;;  %s2644_s1 = sshll.u32 (%p41_p0), %s4178_s0, 4  ;;  %s2645_s1 = int_to_ptr.vmem [resolvable:$true] %s2644_s1 }
  0x65   : > { %3546 = vmatpush1.bf16.msra.mxu0 %v3545_v35  ;;  %3570 = vmatpush1.bf16.msra.mxu1 %v3545_v35  ;;  %v3563_v63 = vpack.c.bf16 %v2782_v61, %v2780_v60  ;;  %v2811_v35 = vld [vmem:[%s5640_s3 + $0x1b8] sm:$0xff]  ;;  %p4146_p2 = scmp.lt.s32.totalorder (%p41_p0), %s2645_s1, %s2645_s1 }
  0x66   : > { %3548 = vmatprep.subr.bf16.mxu0 %v3547_v36  ;;  %3572 = vmatprep.subr.bf16.mxu1 %v3547_v36 }
  0x67   : > { %723 = vmatprep.mubr.f32.mxu0 %v4173_v7  ;;  %810 = vmatprep.mubr.f32.mxu1 %v4173_v7 }
  0x68   : > { %2754 = vmatmul.mubr.msk.f32.gmra.mrb[2].mxu0 %vm104_vm0, %v4542_v5  ;;  %2756 = vmatmul.mubr.msk.f32.gmra.mrb[2].mxu1 %vm104_vm0, %v4632_v42  ;;  %v3591_v5 = vpack.c.bf16 %v2791_v3, %v2789_v2 }
  0x69   : > { %3550 = vmatpush1.bf16.msra.mxu0 %v3549_v41  ;;  %3574 = vmatpush1.bf16.msra.mxu1 %v3549_v41  ;;  %v2815_v41 = vld [vmem:[%s5640_s3 + $0x1d8] sm:$0xff] }
  0x6a   : > { %3552 = vmatprep.subr.bf16.mxu0 %v3551_v43  ;;  %3576 = vmatprep.subr.bf16.mxu1 %v3551_v43  ;;  %v2812_v43 = vld [vmem:[%s5640_s3 + $0x1c0] sm:$0xff] }
  0x6b   : > { %912 = vmatprep.mubr.f32.mxu0 %v4173_v7  ;;  %999 = vmatprep.mubr.f32.mxu1 %v4173_v7  ;;  %v3617_v45 = vpack.c.bf16 %v2814_v44, %v2812_v43  ;;  %v1058_v43 = vld [vmem:[%s5640_s3 + $0xa0] sm:$0xff]  ;;  %v1060_v44 = vld [vmem:[%s5640_s3 + $0xb0] sm:$0xff] }
  0x6d   : > { %3554 = vmatpush1.bf16.msra.mxu0 %v3553_v49  ;;  %3578 = vmatpush1.bf16.msra.mxu1 %v3553_v49  ;;  %v2816_v49 = vld [vmem:[%s5640_s3 + $0x1e0] sm:$0xff] }
  0x6e   : > { %3556 = vmatprep.subr.bf16.mxu0 %v3555_v50  ;;  %3580 = vmatprep.subr.bf16.mxu1 %v3555_v50  ;;  %v3619_v50 = vpack.c.bf16 %v2819_v48, %v2817_v47  ;;  %v3621_v55 = vpack.c.bf16 %v2818_v51, %v2816_v49  ;;  %v1065_v47 = vld [vmem:[%s5640_s3 + $0xd8] sm:$0xff]  ;;  %v3645_v48 = vpack.c.bf16 %v1060_v44, %v1058_v43  ;;  %v1064_v51 = vld [vmem:[%s5640_s3 + $0xd0] sm:$0xff]  ;;  %v2853_v44 = vld [vmem:[%s5640_s3 + $0x308] sm:$0xff] }
  0x6f   : > { %v2850_v43 = vld [vmem:[%s5640_s3 + $0x2f0] sm:$0xff] }
  0x71   : > { %3558 = vmatpush1.bf16.msra.mxu0 %v3557_v56  ;;  %3582 = vmatpush1.bf16.msra.mxu1 %v3557_v56  ;;  %v3623_v56 = vpack.c.bf16 %v1041_v53, %v1039_v52  ;;  %v1067_v52 = vld [vmem:[%s5640_s3 + $0xe8] sm:$0xff]  ;;  %v1069_v53 = vld [vmem:[%s5640_s3 + $0xf8] sm:$0xff] }
  0x72   : > { %3560 = vmatprep.subr.bf16.mxu0 %v3559_v57  ;;  %3584 = vmatprep.subr.bf16.mxu1 %v3559_v57 }
  0x75   : > { %3562 = vmatpush1.bf16.msra.mxu0 %v3561_v62  ;;  %3586 = vmatpush1.bf16.msra.mxu1 %v3561_v62 }
  0x76   : > { %3564 = vmatprep.subr.bf16.mxu0 %v3563_v63  ;;  %3588 = vmatprep.subr.bf16.mxu1 %v3563_v63  ;;  %v2787_v63 = vld [vmem:[%s5639_s2] ss:$0 sm:$0xff] }
  0x79   : > { %3566 = vmatpush1.bf16.msra.mxu0 %v3565_v4  ;;  %3590 = vmatpush1.bf16.msra.mxu1 %v3565_v4 }
  0x7a   : > { %3592 = vmatprep.subr.bf16.mxu0 %v3591_v5  ;;  %3656 = vmatprep.subr.bf16.mxu1 %v3591_v5 }
  0x7c   : > { %2783 = vmatmul.mubr.msk.f32.vlgmr.msra.gmra.mrb[0].mxu0 %vm104_vm0, %v4613_v34  ;;  %2785 = vmatmul.mubr.msk.f32.vlgmr.msra.gmra.mrb[0].mxu1 %vm104_vm0, %v2757_v10  ;;  %v2809_v34 = vld [vmem:[%s5640_s3 + $0x1a8] sm:$0xff] }
  0x7d   : > { %918 = vmatprep.mubr.f32.mxu0 %v4173_v7  ;;  %1005 = vmatprep.mubr.f32.mxu1 %v4173_v7  ;;  %v3611_v36 = vpack.c.bf16 %v2811_v35, %v2809_v34  ;;  %v1057_v34 = vld [vmem:[%s5640_s3 + $0x98] sm:$0xff]  ;;  %v3637_v35 = vpack.c.bf16 %v1052_v32, %v1050_v31  ;;  %v2842_v31 = vld [vmem:[%s5640_s3 + $0x2b0] sm:$0xff]  ;;  %v2845_v32 = vld [vmem:[%s5640_s3 + $0x2c8] sm:$0xff] }
  0x7e   : > { %3594 = vmatpush1.bf16.msra.mxu0 %v3593_v11  ;;  %3658 = vmatpush1.bf16.msra.mxu1 %v3593_v11 }
  0x7f   : > { %3596 = vmatprep.subr.bf16.mxu0 %v3595_v12  ;;  %3660 = vmatprep.subr.bf16.mxu1 %v3595_v12  ;;  %v1038_v12 = vld [vmem:[%s5640_s3] sm:$0xff] }
  0x80   : > { %2784 = vmatmul.mubr.msk.f32.gmra.mrb[2].mxu0 %vm104_vm0, %v4632_v42  ;;  %2786 = vmatmul.mubr.msk.f32.gmra.mrb[2].mxu1 %vm104_vm0, %v2758_v16  ;;  %v3615_v42 = vpack.c.bf16 %v2815_v41, %v2813_v40  ;;  %v3625_v15 = vpack.c.bf16 %v1040_v13, %v1038_v12  ;;  %v1042_v16 = vld [vmem:[%s5640_s3 + $0x20] sm:$0xff]  ;;  %v1061_v40 = vld [vmem:[%s5640_s3 + $0xb8] sm:$0xff]  ;;  %v3641_v41 = vpack.c.bf16 %v1056_v38, %v1054_v37  ;;  %v2830_v13 = vld [vmem:[%s5640_s3 + $0x250] sm:$0xff] }
  0x81   : > { %1169 = vmatprep.mubr.f32.mxu0 %v4173_v7  ;;  %1311 = vmatprep.mubr.f32.mxu1 %v4173_v7  ;;  %v2828_v12 = vld [vmem:[%s5640_s3 + $0x240] sm:$0xff]  ;;  %v2846_v37 = vld [vmem:[%s5640_s3 + $0x2d0] sm:$0xff]  ;;  %v2849_v38 = vld [vmem:[%s5640_s3 + $0x2e8] sm:$0xff] }
  0x82   : > { %3598 = vmatpush1.bf16.msra.mxu0 %v3597_v17  ;;  %3662 = vmatpush1.bf16.msra.mxu1 %v3597_v17  ;;  %v3627_v17 = vpack.c.bf16 %v1045_v54, %v1043_v14  ;;  %v2833_v14 = vld [vmem:[%s5640_s3 + $0x268] sm:$0xff]  ;;  %v2835_v54 = vld [vmem:[%s5640_s3 + $0x278] sm:$0xff] }
  0x83   : > { %3600 = vmatprep.subr.bf16.mxu0 %v3599_v18  ;;  %3664 = vmatprep.subr.bf16.mxu1 %v3599_v18  ;;  %v1044_v18 = vld [vmem:[%s5640_s3 + $0x30] sm:$0xff] }
  0x84   : > { %v3629_v23 = vpack.c.bf16 %v1044_v18, %v1042_v16  ;;  %v3731_v16 = vpack.c.bf16 %v2835_v54, %v2833_v14  ;;  %v2834_v18 = vld [vmem:[%s5640_s3 + $0x270] sm:$0xff] }
  0x86   : > { %3602 = vmatpush1.bf16.msra.mxu0 %v3601_v21  ;;  %3666 = vmatpush1.bf16.msra.mxu1 %v3601_v21 }
  0x87   : > { %3604 = vmatprep.subr.bf16.mxu0 %v3603_v24  ;;  %3668 = vmatprep.subr.bf16.mxu1 %v3603_v24  ;;  %v3631_v24 = vpack.c.bf16 %v1049_v20, %v1047_v19  ;;  %v2837_v19 = vld [vmem:[%s5640_s3 + $0x288] sm:$0xff]  ;;  %v2839_v20 = vld [vmem:[%s5640_s3 + $0x298] sm:$0xff] }
  0x8a   : > { %3606 = vmatpush1.bf16.msra.mxu0 %v3605_v27  ;;  %3670 = vmatpush1.bf16.msra.mxu1 %v3605_v27  ;;  %v1051_v27 = vld [vmem:[%s5640_s3 + $0x68] sm:$0xff] }
  0x8b   : > { %3608 = vmatprep.subr.bf16.mxu0 %v3607_v30  ;;  %3672 = vmatprep.subr.bf16.mxu1 %v3607_v30  ;;  %v3635_v30 = vpack.c.bf16 %v1053_v28, %v1051_v27  ;;  %v2843_v27 = vld [vmem:[%s5640_s3 + $0x2b8] sm:$0xff] }
  0x8e   : > { %3610 = vmatpush1.bf16.msra.mxu0 %v3609_v33  ;;  %3674 = vmatpush1.bf16.msra.mxu1 %v3609_v33  ;;  %v1055_v33 = vld [vmem:[%s5640_s3 + $0x88] sm:$0xff] }
  0x8f   : > { %3612 = vmatprep.subr.bf16.mxu0 %v3611_v36  ;;  %3676 = vmatprep.subr.bf16.mxu1 %v3611_v36  ;;  %v3639_v36 = vpack.c.bf16 %v1057_v34, %v1055_v33  ;;  %v2847_v33 = vld [vmem:[%s5640_s3 + $0x2d8] sm:$0xff] }
  0x92   : > { %3614 = vmatpush1.bf16.msra.mxu0 %v3613_v39  ;;  %3678 = vmatpush1.bf16.msra.mxu1 %v3613_v39  ;;  %v1059_v39 = vld [vmem:[%s5640_s3 + $0xa8] sm:$0xff] }
  0x93   : > { %3616 = vmatprep.subr.bf16.mxu0 %v3615_v42  ;;  %3680 = vmatprep.subr.bf16.mxu1 %v3615_v42  ;;  %v3643_v42 = vpack.c.bf16 %v1061_v40, %v1059_v39  ;;  %v2851_v39 = vld [vmem:[%s5640_s3 + $0x2f8] sm:$0xff] }
  0x96   : > { %3618 = vmatpush1.bf16.msra.mxu0 %v3617_v45  ;;  %3682 = vmatpush1.bf16.msra.mxu1 %v3617_v45  ;;  %v1063_v45 = vld [vmem:[%s5640_s3 + $0xc8] sm:$0xff] }
  0x97   : > { %3620 = vmatprep.subr.bf16.mxu0 %v3619_v50  ;;  %3684 = vmatprep.subr.bf16.mxu1 %v3619_v50  ;;  %v3647_v49 = vpack.c.bf16 %v1065_v47, %v1063_v45  ;;  %v1062_v50 = vld [vmem:[%s5640_s3 + $0xc0] sm:$0xff]  ;;  %v2855_v45 = vld [vmem:[%s5640_s3 + $0x318] sm:$0xff] }
  0x9a   : > { %3622 = vmatpush1.bf16.msra.mxu0 %v3621_v55  ;;  %3686 = vmatpush1.bf16.msra.mxu1 %v3621_v55  ;;  %v3649_v55 = vpack.c.bf16 %v1064_v51, %v1062_v50  ;;  %v2854_v50 = vld [vmem:[%s5640_s3 + $0x310] sm:$0xff]  ;;  %v2857_v51 = vld [vmem:[%s5640_s3 + $0x328] sm:$0xff] }
  0x9b   : > { %3624 = vmatprep.subr.bf16.mxu0 %v3623_v56  ;;  %3688 = vmatprep.subr.bf16.mxu1 %v3623_v56  ;;  %v3651_v56 = vpack.c.bf16 %v1069_v53, %v1067_v52  ;;  %v2859_v52 = vld [vmem:[%s5640_s3 + $0x338] sm:$0xff] }
 0x14f   : > { %v914_v57 = vpop.f32.mrb[0].mxu0  ;;  %v1001_v58 = vpop.f32.mrb[0].mxu1 }
 0x150   : > { %v916_v59 = vpop.f32.mrb[1].mxu0  ;;  %v1003_v60 = vpop.f32.mrb[1].mxu1 }
 0x151   : > { %v1016_v61 = vmax.f32 %v914_v57, %v916_v59  ;;  %v1018_v62 = vmax.f32 %v1001_v58, %v1003_v60  ;;  %v1066_v57 = vld [vmem:[%s5640_s3 + $0xe0] sm:$0xff]  ;;  %v1068_v58 = vld [vmem:[%s5640_s3 + $0xf0] sm:$0xff]  ;;  %v2821_v59 = vld [vmem:[%s5640_s3 + $0x208] sm:$0xff] }
 0x152   : > { %v2823_v60 = vld [vmem:[%s5640_s3 + $0x218] sm:$0xff] }
 0x153   : > { %v1020_v0 = vmax.f32 %v1016_v61, %v1018_v62  ;;  %v920_v1 = vpop.f32.mrb[2].mxu0  ;;  %v1007_v2 = vpop.f32.mrb[2].mxu1  ;;  %v3653_v61 = vpack.c.bf16 %v1068_v58, %v1066_v57  ;;  %v3719_v62 = vpack.c.bf16 %v2823_v60, %v2821_v59  ;;  %v2858_v57 = vld [vmem:[%s5640_s3 + $0x330] sm:$0xff]  ;;  %v2861_v59 = vld [vmem:[%s5640_s3 + $0x348] sm:$0xff]  ;;  %v2863_v60 = vld [vmem:[%s5640_s3 + $0x358] sm:$0xff] }
 0x154   : > { %v922_v3 = vpop.f32.mrb[3].mxu0  ;;  %v1009_v4 = vpop.f32.mrb[3].mxu1 }
 0x155   : > { %v1029_v5 = vadd.f32 %v2787_v63, %v1020_v0  ;;  %v1017_v6 = vmax.f32 %v920_v1, %v922_v3  ;;  %v1019_v8 = vmax.f32 %v1007_v2, %v1009_v4  ;;  %v2822_v0 = vld [vmem:[%s5640_s3 + $0x210] sm:$0xff]  ;;  %v2825_v1 = vld [vmem:[%s5640_s3 + $0x228] sm:$0xff]  ;;  %v2827_v2 = vld [vmem:[%s5640_s3 + $0x238] sm:$0xff] }
 0x156   : > { %v3723_v4 = vpack.c.bf16 %v2827_v2, %v2825_v1  ;;  %v2867_v1 = vld [vmem:[%s5640_s3 + $0x378] sm:$0xff] }
 0x157   : > { %v1031_v9 = vmax.f32 %v1029_v5, 0.0  ;;  %v1021_v46 = vmax.f32 %v1017_v6, %v1019_v8  ;;  %v2824_v5 = vld [vmem:[%s5640_s3 + $0x220] sm:$0xff]  ;;  %v2826_v6 = vld [vmem:[%s5640_s3 + $0x230] sm:$0xff] }
 0x159   : > { %1033 = vst [vmem:[#allocation2] sm:$0xff] %v1031_v9  ;;  %v1030_v10 = vadd.f32 %v2787_v63, %v1021_v46  ;;  %v2820_v63 = vld [vmem:[%s5640_s3 + $0x200] sm:$0xff]  ;;  %v2829_v9 = vld [vmem:[%s5640_s3 + $0x248] sm:$0xff]  ;;  %v2831_v46 = vld [vmem:[%s5640_s3 + $0x258] sm:$0xff] }
 0x15a   : > { %v3721_v3 = vpack.c.bf16 %v2822_v0, %v2820_v63  ;;  %v2860_v63 = vld [vmem:[%s5640_s3 + $0x340] sm:$0xff]  ;;  %v2862_v0 = vld [vmem:[%s5640_s3 + $0x350] sm:$0xff] }
 0x15b   : > { %v1032_v11 = vmax.f32 %v1030_v10, 0.0  ;;  %v3725_v10 = vpack.c.bf16 %v2826_v6, %v2824_v5  ;;  %v3793_v2 = vpack.c.bf16 %v2862_v0, %v2860_v63  ;;  %v2866_v5 = vld [vmem:[%s5640_s3 + $0x370] sm:$0xff]  ;;  %v2869_v6 = vld [vmem:[%s5640_s3 + $0x388] sm:$0xff]  ;;  %v2907_v63 = vld [vmem:[%s5640_s3 + $0x4b8] sm:$0xff] }
 0x15d   : > { %1034 = vst [vmem:[#allocation2 + $0x8] sm:$0x3f] %v1032_v11  ;;  %v3727_v11 = vpack.c.bf16 %v2831_v46, %v2829_v9 }
 0x164   : > { %v4825_v21 = vld [vmem:[#allocation2 + $0x1] ss:$2 sm:$0x1f]  ;;  %v4827_v22 = vld [vmem:[#allocation2 + $0x2] ss:$2 sm:$0x1f] }
 0x165   : > { %1170 = vmatmul.mubr.f32.vlgmr.msra.gmra.mrb[4].mxu0 %v4825_v21  ;;  %1312 = vmatmul.mubr.f32.vlgmr.msra.gmra.mrb[4].mxu1 %v4827_v22  ;;  %v1035_v8 = vld [vmem:[#allocation2] ss:$2 sm:$0x1f]  ;;  %v5022_v58 = vld [vmem:[#allocation2 + $0x3] ss:$2 sm:$0x1f] }
 0x166   : > { %3626 = vmatpush1.bf16.msra.mxu0 %v3625_v15  ;;  %3690 = vmatpush1.bf16.msra.mxu1 %v3625_v15  ;;  %v3729_v15 = vpack.c.bf16 %v2830_v13, %v2828_v12  ;;  %v2873_v12 = vld [vmem:[%s5640_s3 + $0x3a8] sm:$0xff]  ;;  %v2875_v13 = vld [vmem:[%s5640_s3 + $0x3b8] sm:$0xff] }
 0x167   : > { %3628 = vmatprep.subr.bf16.mxu0 %v3627_v17  ;;  %3692 = vmatprep.subr.bf16.mxu1 %v3627_v17  ;;  %v2832_v17 = vld [vmem:[%s5640_s3 + $0x260] sm:$0xff]  ;;  %v3803_v54 = vpack.c.bf16 %v2875_v13, %v2873_v12 }
 0x168   : > { %1240 = vmatprep.mubr.f32.mxu0 %v4173_v7  ;;  %1382 = vmatprep.mubr.f32.mxu1 %v4173_v7  ;;  %v2912_v13 = vld [vmem:[%s5640_s3 + $0x4e0] sm:$0xff] }
 0x16a   : > { %3630 = vmatpush1.bf16.msra.mxu0 %v3629_v23  ;;  %3694 = vmatpush1.bf16.msra.mxu1 %v3629_v23  ;;  %v3735_v23 = vpack.c.bf16 %v2839_v20, %v2837_v19 }
 0x16b   : > { %3632 = vmatprep.subr.bf16.mxu0 %v3631_v24  ;;  %3696 = vmatprep.subr.bf16.mxu1 %v3631_v24  ;;  %v2836_v24 = vld [vmem:[%s5640_s3 + $0x280] sm:$0xff] }
 0x16c   : > { %v3737_v28 = vpack.c.bf16 %v2838_v25, %v2836_v24  ;;  %v2881_v24 = vld [vmem:[%s5640_s3 + $0x3e8] sm:$0xff]  ;;  %v2883_v25 = vld [vmem:[%s5640_s3 + $0x3f8] sm:$0xff] }
 0x16e   : > { %3634 = vmatpush1.bf16.msra.mxu0 %v3633_v29  ;;  %3698 = vmatpush1.bf16.msra.mxu1 %v3633_v29  ;;  %v3739_v29 = vpack.c.bf16 %v2843_v27, %v2841_v26  ;;  %v3811_v27 = vpack.c.bf16 %v2883_v25, %v2881_v24 }
 0x16f   : > { %3636 = vmatprep.subr.bf16.mxu0 %v3635_v30  ;;  %3700 = vmatprep.subr.bf16.mxu1 %v3635_v30  ;;  %v2840_v30 = vld [vmem:[%s5640_s3 + $0x2a0] sm:$0xff] }
 0x170   : > { %v3741_v34 = vpack.c.bf16 %v2842_v31, %v2840_v30  ;;  %v2885_v30 = vld [vmem:[%s5640_s3 + $0x408] sm:$0xff]  ;;  %v2887_v31 = vld [vmem:[%s5640_s3 + $0x418] sm:$0xff] }
 0x172   : > { %3638 = vmatpush1.bf16.msra.mxu0 %v3637_v35  ;;  %3702 = vmatpush1.bf16.msra.mxu1 %v3637_v35  ;;  %v3743_v35 = vpack.c.bf16 %v2847_v33, %v2845_v32  ;;  %v3847_v33 = vpack.c.bf16 %v2887_v31, %v2885_v30 }
 0x173   : > { %3640 = vmatprep.subr.bf16.mxu0 %v3639_v36  ;;  %3704 = vmatprep.subr.bf16.mxu1 %v3639_v36  ;;  %v2844_v36 = vld [vmem:[%s5640_s3 + $0x2c0] sm:$0xff] }
 0x174   : > { %v3745_v40 = vpack.c.bf16 %v2846_v37, %v2844_v36  ;;  %v2889_v36 = vld [vmem:[%s5640_s3 + $0x428] sm:$0xff]  ;;  %v2891_v37 = vld [vmem:[%s5640_s3 + $0x438] sm:$0xff] }
 0x176   : > { %3642 = vmatpush1.bf16.msra.mxu0 %v3641_v41  ;;  %3706 = vmatpush1.bf16.msra.mxu1 %v3641_v41  ;;  %v3747_v41 = vpack.c.bf16 %v2851_v39, %v2849_v38  ;;  %v3851_v39 = vpack.c.bf16 %v2891_v37, %v2889_v36 }
 0x177   : > { %3644 = vmatprep.subr.bf16.mxu0 %v3643_v42  ;;  %3708 = vmatprep.subr.bf16.mxu1 %v3643_v42  ;;  %v2848_v42 = vld [vmem:[%s5640_s3 + $0x2e0] sm:$0xff] }
 0x178   : > { %v3749_v47 = vpack.c.bf16 %v2850_v43, %v2848_v42  ;;  %v5124_v42 = vld [vmem:[#allocation2 + $0x4] ss:$2 sm:$0x1f] }
 0x179   : > { %v2893_v43 = vld [vmem:[%s5640_s3 + $0x448] sm:$0xff] }
 0x17a   : > { %3646 = vmatpush1.bf16.msra.mxu0 %v3645_v48  ;;  %3710 = vmatpush1.bf16.msra.mxu1 %v3645_v48  ;;  %v3783_v48 = vpack.c.bf16 %v2855_v45, %v2853_v44  ;;  %v2895_v44 = vld [vmem:[%s5640_s3 + $0x458] sm:$0xff] }
 0x17b   : > { %3648 = vmatprep.subr.bf16.mxu0 %v3647_v49  ;;  %3712 = vmatprep.subr.bf16.mxu1 %v3647_v49  ;;  %v2852_v49 = vld [vmem:[%s5640_s3 + $0x300] sm:$0xff] }
 0x17c   : > { %v3785_v53 = vpack.c.bf16 %v2854_v50, %v2852_v49  ;;  %v2894_v49 = vld [vmem:[%s5640_s3 + $0x450] sm:$0xff]  ;;  %v2897_v50 = vld [vmem:[%s5640_s3 + $0x468] sm:$0xff] }
 0x17e   : > { %3650 = vmatpush1.bf16.msra.mxu0 %v3649_v55  ;;  %3714 = vmatpush1.bf16.msra.mxu1 %v3649_v55  ;;  %v3787_v55 = vpack.c.bf16 %v2859_v52, %v2857_v51  ;;  %v2899_v51 = vld [vmem:[%s5640_s3 + $0x478] sm:$0xff] }
 0x17f   : > { %3652 = vmatprep.subr.bf16.mxu0 %v3651_v56  ;;  %3716 = vmatprep.subr.bf16.mxu1 %v3651_v56  ;;  %v2856_v56 = vld [vmem:[%s5640_s3 + $0x320] sm:$0xff] }
 0x182   : > { %3654 = vmatpush1.bf16.msra.mxu0 %v3653_v61  ;;  %3718 = vmatpush1.bf16.msra.mxu1 %v3653_v61  ;;  %v3789_v61 = vpack.c.bf16 %v2858_v57, %v2856_v56  ;;  %v2898_v56 = vld [vmem:[%s5640_s3 + $0x470] sm:$0xff]  ;;  %v2901_v57 = vld [vmem:[%s5640_s3 + $0x488] sm:$0xff] }
 0x183   : > { %3720 = vmatprep.subr.bf16.mxu0 %v3719_v62  ;;  %3752 = vmatprep.subr.bf16.mxu1 %v3719_v62  ;;  %v3791_v62 = vpack.c.bf16 %v2863_v60, %v2861_v59  ;;  %v2900_v60 = vld [vmem:[%s5640_s3 + $0x480] sm:$0xff] }
 0x185   : > { %1241 = vmatmul.mubr.f32.vlgmr.msra.gmra.mrb[4].mxu0 %v1035_v8  ;;  %1383 = vmatmul.mubr.f32.vlgmr.msra.gmra.mrb[4].mxu1 %v4825_v21  ;;  %v3733_v21 = vpack.c.bf16 %v2834_v18, %v2832_v17  ;;  %v2871_v8 = vld [vmem:[%s5640_s3 + $0x398] sm:$0xff]  ;;  %v2877_v17 = vld [vmem:[%s5640_s3 + $0x3c8] sm:$0xff] }
 0x186   : > { %3722 = vmatpush1.bf16.msra.mxu0 %v3721_v3  ;;  %3754 = vmatpush1.bf16.msra.mxu1 %v3721_v3  ;;  %v3799_v46 = vpack.c.bf16 %v2871_v8, %v2869_v6  ;;  %v2879_v18 = vld [vmem:[%s5640_s3 + $0x3d8] sm:$0xff]  ;;  %v2908_v8 = vld [vmem:[%s5640_s3 + $0x4c0] sm:$0xff] }
 0x187   : > { %3724 = vmatprep.subr.bf16.mxu0 %v3723_v4  ;;  %3756 = vmatprep.subr.bf16.mxu1 %v3723_v4  ;;  %v2864_v4 = vld [vmem:[%s5640_s3 + $0x360] sm:$0xff]  ;;  %v3807_v20 = vpack.c.bf16 %v2879_v18, %v2877_v17  ;;  %v1949_v18 = vlaneseq }
 0x188   : > { %1488 = vmatprep.mubr.f32.mxu0 %v4173_v7  ;;  %1561 = vmatprep.mubr.f32.mxu1 %v4173_v7  ;;  %v3797_v9 = vpack.c.bf16 %v2866_v5, %v2864_v4  ;;  %v2911_v4 = vld [vmem:[%s5640_s3 + $0x4d8] sm:$0xff] }
 0x18a   : > { %3726 = vmatpush1.bf16.msra.mxu0 %v3725_v10  ;;  %3758 = vmatpush1.bf16.msra.mxu1 %v3725_v10  ;;  %v2868_v10 = vld [vmem:[%s5640_s3 + $0x380] sm:$0xff] }
 0x18b   : > { %3728 = vmatprep.subr.bf16.mxu0 %v3727_v11  ;;  %3760 = vmatprep.subr.bf16.mxu1 %v3727_v11  ;;  %v2870_v11 = vld [vmem:[%s5640_s3 + $0x390] sm:$0xff] }
 0x18c   : > { %v3801_v14 = vpack.c.bf16 %v2870_v11, %v2868_v10  ;;  %v2915_v10 = vld [vmem:[%s5640_s3 + $0x4f8] sm:$0xff] }
 0x18e   : > { %3730 = vmatpush1.bf16.msra.mxu0 %v3729_v15  ;;  %3762 = vmatpush1.bf16.msra.mxu1 %v3729_v15  ;;  %v2872_v15 = vld [vmem:[%s5640_s3 + $0x3a0] sm:$0xff] }
 0x18f   : > { %3732 = vmatprep.subr.bf16.mxu0 %v3731_v16  ;;  %3764 = vmatprep.subr.bf16.mxu1 %v3731_v16  ;;  %v2874_v16 = vld [vmem:[%s5640_s3 + $0x3b0] sm:$0xff] }
 0x190   : > { %v3805_v19 = vpack.c.bf16 %v2874_v16, %v2872_v15  ;;  %v1752_v15 = vld [vmem:[#allocation2 + $0x5] ss:$2 sm:$0x1f]  ;;  %v4174_v16 = vmov 1966171168  }
 0x191   : > { %v1947_v17 = vunpack.c.l.s4 %v4174_v16  ;;  %v2008_v16 = vld [vmem:[%s5642_s5 + $0x60] sm:$0xff] (%p41_p0) }
 0x192   : > { %3734 = vmatpush1.bf16.msra.mxu0 %v3733_v21  ;;  %3766 = vmatpush1.bf16.msra.mxu1 %v3733_v21  ;;  %v2876_v21 = vld [vmem:[%s5640_s3 + $0x3c0] sm:$0xff] }
 0x193   : > { %3736 = vmatprep.subr.bf16.mxu0 %v3735_v23  ;;  %3768 = vmatprep.subr.bf16.mxu1 %v3735_v23  ;;  %v2878_v23 = vld [vmem:[%s5640_s3 + $0x3d0] sm:$0xff] }
 0x194   : > { %v3809_v26 = vpack.c.bf16 %v2878_v23, %v2876_v21 }
 0x196   : > { %3738 = vmatpush1.bf16.msra.mxu0 %v3737_v28  ;;  %3770 = vmatpush1.bf16.msra.mxu1 %v3737_v28  ;;  %v2880_v28 = vld [vmem:[%s5640_s3 + $0x3e0] sm:$0xff] }
 0x197   : > { %3740 = vmatprep.subr.bf16.mxu0 %v3739_v29  ;;  %3772 = vmatprep.subr.bf16.mxu1 %v3739_v29  ;;  %v2882_v29 = vld [vmem:[%s5640_s3 + $0x3f0] sm:$0xff] }
 0x198   : > { %v3813_v32 = vpack.c.bf16 %v2882_v29, %v2880_v28  ;;  %v2916_v28 = vld [vmem:[%s5641_s4] ss:$0 sm:$0xff] }
 0x19a   : > { %3742 = vmatpush1.bf16.msra.mxu0 %v3741_v34  ;;  %3774 = vmatpush1.bf16.msra.mxu1 %v3741_v34  ;;  %v2884_v34 = vld [vmem:[%s5640_s3 + $0x400] sm:$0xff] }
 0x19b   : > { %3744 = vmatprep.subr.bf16.mxu0 %v3743_v35  ;;  %3776 = vmatprep.subr.bf16.mxu1 %v3743_v35  ;;  %v2886_v35 = vld [vmem:[%s5640_s3 + $0x410] sm:$0xff] }
 0x19c   : > { %v3849_v38 = vpack.c.bf16 %v2886_v35, %v2884_v34 }
 0x19e   : > { %3746 = vmatpush1.bf16.msra.mxu0 %v3745_v40  ;;  %3778 = vmatpush1.bf16.msra.mxu1 %v3745_v40  ;;  %v2888_v40 = vld [vmem:[%s5640_s3 + $0x420] sm:$0xff] }
 0x19f   : > { %3748 = vmatprep.subr.bf16.mxu0 %v3747_v41  ;;  %3780 = vmatprep.subr.bf16.mxu1 %v3747_v41  ;;  %v2890_v41 = vld [vmem:[%s5640_s3 + $0x430] sm:$0xff] }
 0x1a0   : > { %v3853_v45 = vpack.c.bf16 %v2890_v41, %v2888_v40  ;;  %v2920_v41 = vld [vmem:[%s5642_s5 + $0x80] sm:$0xff] (%p41_p0) }
 0x1a2   : > { %3750 = vmatpush1.bf16.msra.mxu0 %v3749_v47  ;;  %3782 = vmatpush1.bf16.msra.mxu1 %v3749_v47  ;;  %v3855_v47 = vpack.c.bf16 %v2895_v44, %v2893_v43  ;;  %v1996_v43 = vld [vmem:[%s5642_s5] sm:$0xff] (%p41_p0)  ;;  %v4175_v44 = vmov (%p41_p0), 0.0|0.0  }
 0x1a3   : > { %3784 = vmatprep.subr.bf16.mxu0 %v3783_v48  ;;  %3816 = vmatprep.subr.bf16.mxu1 %v3783_v48  ;;  %v2892_v48 = vld [vmem:[%s5640_s3 + $0x440] sm:$0xff] }
 0x1a4   : > { %v3857_v52 = vpack.c.bf16 %v2894_v49, %v2892_v48  ;;  %v2922_v48 = vld [vmem:[%s5642_s5 + $0x90] sm:$0xff] (%p41_p0)  ;;  %v2923_v49 = vld [vmem:[%s5642_s5 + $0x98] sm:$0xff] (%p41_p0) }
 0x1a5   : > { %1489 = vmatmul.mubr.f32.vlgmr.msra.gmra.mrb[4].mxu0 %v4827_v22  ;;  %1562 = vmatmul.mubr.f32.vlgmr.msra.gmra.mrb[4].mxu1 %v5022_v58  ;;  %v2865_v22 = vld [vmem:[%s5640_s3 + $0x368] sm:$0xff] }
 0x1a6   : > { %3786 = vmatpush1.bf16.msra.mxu0 %v3785_v53  ;;  %3818 = vmatpush1.bf16.msra.mxu1 %v3785_v53  ;;  %v3795_v3 = vpack.c.bf16 %v2867_v1, %v2865_v22  ;;  %v3859_v53 = vpack.c.bf16 %v2899_v51, %v2897_v50  ;;  %v2904_v1 = vld [vmem:[%s5640_s3 + $0x4a0] sm:$0xff]  ;;  %v1998_v51 = vld [vmem:[%s5642_s5 + $0x10] sm:$0xff] (%p41_p0) }
 0x1a7   : > { %3788 = vmatprep.subr.bf16.mxu0 %v3787_v55  ;;  %3820 = vmatprep.subr.bf16.mxu1 %v3787_v55  ;;  %v2896_v55 = vld [vmem:[%s5640_s3 + $0x460] sm:$0xff] }
 0x1a8   : > { %1669 = vmatprep.mubr.f32.mxu0 %v4173_v7  ;;  %1742 = vmatprep.mubr.f32.mxu1 %v4173_v7 }
 0x1aa   : > { %3790 = vmatpush1.bf16.msra.mxu0 %v3789_v61  ;;  %3822 = vmatpush1.bf16.msra.mxu1 %v3789_v61  ;;  %v2902_v61 = vld [vmem:[%s5640_s3 + $0x490] sm:$0xff] }
 0x1ab   : > { %3792 = vmatprep.subr.bf16.mxu0 %v3791_v62  ;;  %3824 = vmatprep.subr.bf16.mxu1 %v3791_v62  ;;  %v2905_v62 = vld [vmem:[%s5640_s3 + $0x4a8] sm:$0xff]  ;;  %v3865_v0 = vpack.c.bf16 %v2902_v61, %v2900_v60 }
 0x1ac   : > { %v3867_v22 = vpack.c.bf16 %v2907_v63, %v2905_v62  ;;  %v2926_v62 = vld [vmem:[%s5642_s5 + $0xb0] sm:$0xff] (%p41_p0)  ;;  %v2927_v63 = vld [vmem:[%s5642_s5 + $0xb8] sm:$0xff] (%p41_p0) }
 0x1ae   : > { %3794 = vmatpush1.bf16.msra.mxu0 %v3793_v2  ;;  %3826 = vmatpush1.bf16.msra.mxu1 %v3793_v2  ;;  %v2906_v2 = vld [vmem:[%s5640_s3 + $0x4b0] sm:$0xff] }
 0x1af   : > { %3796 = vmatprep.subr.bf16.mxu0 %v3795_v3  ;;  %3828 = vmatprep.subr.bf16.mxu1 %v3795_v3  ;;  %v2909_v3 = vld [vmem:[%s5640_s3 + $0x4c8] sm:$0xff]  ;;  %v3869_v5 = vpack.c.bf16 %v2906_v2, %v2904_v1  ;;  %v3921_v1 = vpack.c.bf16 (%p41_p0), %v2927_v63, %v2926_v62  ;;  %v2946_v62 = vld [vmem:[%s5642_s5 + $0x150] sm:$0xff] (%p41_p0)  ;;  %v2947_v63 = vld [vmem:[%s5642_s5 + $0x158] sm:$0xff] (%p41_p0) }
 0x1b0   : > { %v3871_v6 = vpack.c.bf16 %v2911_v4, %v2909_v3  ;;  %v2928_v3 = vld [vmem:[%s5642_s5 + $0xc0] sm:$0xff] (%p41_p0)  ;;  %v2929_v4 = vld [vmem:[%s5642_s5 + $0xc8] sm:$0xff] (%p41_p0) }
 0x1b2   : > { %3798 = vmatpush1.bf16.msra.mxu0 %v3797_v9  ;;  %3830 = vmatpush1.bf16.msra.mxu1 %v3797_v9  ;;  %v2910_v9 = vld [vmem:[%s5640_s3 + $0x4d0] sm:$0xff] }
 0x1b3   : > { %3800 = vmatprep.subr.bf16.mxu0 %v3799_v46  ;;  %3832 = vmatprep.subr.bf16.mxu1 %v3799_v46  ;;  %v2913_v46 = vld [vmem:[%s5640_s3 + $0x4e8] sm:$0xff]  ;;  %v3873_v11 = vpack.c.bf16 %v2910_v9, %v2908_v8  ;;  %v3924_v8 = vpack.c.bf16 (%p41_p0), %v2929_v4, %v2928_v3  ;;  %v2948_v3 = vld [vmem:[%s5642_s5 + $0x160] sm:$0xff] (%p41_p0) }
 0x1b4   : > { %v3875_v12 = vpack.c.bf16 %v2915_v10, %v2913_v46  ;;  %v2930_v46 = vld [vmem:[%s5642_s5 + $0xd0] sm:$0xff] (%p41_p0)  ;;  %v2931_v10 = vld [vmem:[%s5642_s5 + $0xd8] sm:$0xff] (%p41_p0)  ;;  %v2949_v4 = vld [vmem:[%s5642_s5 + $0x168] sm:$0xff] (%p41_p0) }
 0x1b6   : > { %3802 = vmatpush1.bf16.msra.mxu0 %v3801_v14  ;;  %3834 = vmatpush1.bf16.msra.mxu1 %v3801_v14  ;;  %v2914_v14 = vld [vmem:[%s5640_s3 + $0x4f0] sm:$0xff] }
 0x1b7   : > { %3804 = vmatprep.subr.bf16.mxu0 %v3803_v54  ;;  %3836 = vmatprep.subr.bf16.mxu1 %v3803_v54  ;;  %v3877_v54 = vpack.c.bf16 %v2914_v14, %v2912_v13  ;;  %v3927_v13 = vpack.c.bf16 (%p41_p0), %v2931_v10, %v2930_v46  ;;  %v2950_v46 = vld [vmem:[%s5642_s5 + $0x170] sm:$0xff] (%p41_p0)  ;;  %v2951_v10 = vld [vmem:[%s5642_s5 + $0x178] sm:$0xff] (%p41_p0) }
 0x1ba   : > { %3806 = vmatpush1.bf16.msra.mxu0 %v3805_v19  ;;  %3838 = vmatpush1.bf16.msra.mxu1 %v3805_v19 }
 0x1bb   : > { %3808 = vmatprep.subr.bf16.mxu0 %v3807_v20  ;;  %3840 = vmatprep.subr.bf16.mxu1 %v3807_v20 }
 0x1be   : > { %3810 = vmatpush1.bf16.msra.mxu0 %v3809_v26  ;;  %3842 = vmatpush1.bf16.msra.mxu1 %v3809_v26  ;;  %v1948_v26 = vunpack.c.0.s8 %v1947_v17  ;;  %v2009_v17 = vld [vmem:[%s5642_s5 + $0x68] sm:$0xff] (%p41_p0) }
 0x1bf   : > { %3812 = vmatprep.subr.bf16.mxu0 %v3811_v27  ;;  %3844 = vmatprep.subr.bf16.mxu1 %v3811_v27  ;;  %v1950_v27 = vshrl.u32 %v1949_v18, 7 }
 0x1c1   : > { %v1951_v31 = vsub.s32 %v1948_v26, %v1950_v27  ;;  %v2936_v27 = vld [vmem:[%s5642_s5 + $0x100] sm:$0xff] (%p41_p0) }
 0x1c2   : > { %3814 = vmatpush1.bf16.msra.mxu0 %v3813_v32  ;;  %3846 = vmatpush1.bf16.msra.mxu1 %v3813_v32 }
 0x1c3   : > { %3848 = vmatprep.subr.bf16.mxu0 %v3847_v33  ;;  %3880 = vmatprep.subr.bf16.mxu1 %v3847_v33 }
 0x1c5   : > { %1670 = vmatmul.mubr.f32.vlgmr.msra.gmra.mrb[4].mxu0 %v5022_v58  ;;  %1743 = vmatmul.mubr.f32.vlgmr.msra.gmra.mrb[4].mxu1 %v5124_v42  ;;  %v3861_v58 = vpack.c.bf16 %v2898_v56, %v2896_v55  ;;  %v3915_v55 = vpack.c.bf16 (%p41_p0), %v2923_v49, %v2922_v48  ;;  %v2942_v49 = vld [vmem:[%s5642_s5 + $0x130] sm:$0xff] (%p41_p0) }
 0x1c6   : > { %3850 = vmatpush1.bf16.msra.mxu0 %v3849_v38  ;;  %3882 = vmatpush1.bf16.msra.mxu1 %v3849_v38 }
 0x1c7   : > { %3852 = vmatprep.subr.bf16.mxu0 %v3851_v39  ;;  %3884 = vmatprep.subr.bf16.mxu1 %v3851_v39 }
 0x1c8   : > { %1850 = vmatprep.mubr.f32.mxu0 %v4173_v7  ;;  %1923 = vmatprep.mubr.f32.mxu1 %v4173_v7  ;;  %v2903_v7 = vld [vmem:[%s5640_s3 + $0x498] sm:$0xff] }
 0x1c9   : > { %v3863_v59 = vpack.c.bf16 %v2903_v7, %v2901_v57  ;;  %v2924_v57 = vld [vmem:[%s5642_s5 + $0xa0] sm:$0xff] (%p41_p0)  ;;  %v2925_v7 = vld [vmem:[%s5642_s5 + $0xa8] sm:$0xff] (%p41_p0) }
 0x1ca   : > { %3854 = vmatpush1.bf16.msra.mxu0 %v3853_v45  ;;  %3886 = vmatpush1.bf16.msra.mxu1 %v3853_v45  ;;  %v3918_v60 = vpack.c.bf16 (%p41_p0), %v2925_v7, %v2924_v57  ;;  %v2944_v57 = vld [vmem:[%s5642_s5 + $0x140] sm:$0xff] (%p41_p0)  ;;  %v2945_v7 = vld [vmem:[%s5642_s5 + $0x148] sm:$0xff] (%p41_p0) }
 0x1cb   : > { %3856 = vmatprep.subr.bf16.mxu0 %v3855_v47  ;;  %3888 = vmatprep.subr.bf16.mxu1 %v3855_v47  ;;  %v1997_v47 = vld [vmem:[%s5642_s5 + $0x8] sm:$0xff] (%p41_p0) }
 0x1cc   :  { %v3936_v50 = vpack.c.bf16 (%p41_p0), %v1997_v47, %v1996_v43  ;;  %v2956_v43 = vld [vmem:[%s5642_s5 + $0x1a0] sm:$0xff] (%p41_p0) }
 0x1ce   : > { %3858 = vmatpush1.bf16.msra.mxu0 %v3857_v52  ;;  %3890 = vmatpush1.bf16.msra.mxu1 %v3857_v52  ;;  %v1999_v52 = vld [vmem:[%s5642_s5 + $0x18] sm:$0xff] (%p41_p0) }
 0x1cf   : > { %3860 = vmatprep.subr.bf16.mxu0 %v3859_v53  ;;  %3892 = vmatprep.subr.bf16.mxu1 %v3859_v53  ;;  %v4177_v53 = vmov (%p41_p0), 0.0   ;;  %v3939_v56 = vpack.c.bf16 (%p41_p0), %v1999_v52, %v1998_v51  ;;  %v2958_v51 = vld [vmem:[%s5642_s5 + $0x1b0] sm:$0xff] (%p41_p0)  ;;  %v2959_v52 = vld [vmem:[%s5642_s5 + $0x1b8] sm:$0xff] (%p41_p0) }
 0x1d2   : > { %3862 = vmatpush1.bf16.msra.mxu0 %v3861_v58  ;;  %3894 = vmatpush1.bf16.msra.mxu1 %v3861_v58  ;;  %v2000_v58 = vld [vmem:[%s5642_s5 + $0x20] sm:$0xff] (%p41_p0) }
 0x1d3   : > { %3864 = vmatprep.subr.bf16.mxu0 %v3863_v59  ;;  %3896 = vmatprep.subr.bf16.mxu1 %v3863_v59  ;;  %v2001_v59 = vld [vmem:[%s5642_s5 + $0x28] sm:$0xff] (%p41_p0) }
 0x1d4   :  { %v3942_v61 = vpack.c.bf16 (%p41_p0), %v2001_v59, %v2000_v58  ;;  %v2960_v58 = vld [vmem:[%s5642_s5 + $0x1c0] sm:$0xff] (%p41_p0)  ;;  %v2961_v59 = vld [vmem:[%s5642_s5 + $0x1c8] sm:$0xff] (%p41_p0) }
 0x1d6   : > { %3866 = vmatpush1.bf16.msra.mxu0 %v3865_v0  ;;  %3898 = vmatpush1.bf16.msra.mxu1 %v3865_v0  ;;  %v2002_v0 = vld [vmem:[%s5642_s5 + $0x30] sm:$0xff] (%p41_p0) }
 0x1d7   : > { %3868 = vmatprep.subr.bf16.mxu0 %v3867_v22  ;;  %3900 = vmatprep.subr.bf16.mxu1 %v3867_v22  ;;  %v2003_v22 = vld [vmem:[%s5642_s5 + $0x38] sm:$0xff] (%p41_p0) }
 0x1d8   :  { %v3945_v2 = vpack.c.bf16 (%p41_p0), %v2003_v22, %v2002_v0  ;;  %v2962_v0 = vld [vmem:[%s5642_s5 + $0x1d0] sm:$0xff] (%p41_p0)  ;;  %v2963_v22 = vld [vmem:[%s5642_s5 + $0x1d8] sm:$0xff] (%p41_p0) }
 0x1da   : > { %3870 = vmatpush1.bf16.msra.mxu0 %v3869_v5  ;;  %3902 = vmatpush1.bf16.msra.mxu1 %v3869_v5  ;;  %v2004_v5 = vld [vmem:[%s5642_s5 + $0x40] sm:$0xff] (%p41_p0) }
 0x1db   : > { %3872 = vmatprep.subr.bf16.mxu0 %v3871_v6  ;;  %3904 = vmatprep.subr.bf16.mxu1 %v3871_v6  ;;  %v2005_v6 = vld [vmem:[%s5642_s5 + $0x48] sm:$0xff] (%p41_p0) }
 0x1dc   :  { %v3948_v9 = vpack.c.bf16 (%p41_p0), %v2005_v6, %v2004_v5  ;;  %v2964_v5 = vld [vmem:[%s5642_s5 + $0x1e0] sm:$0xff] (%p41_p0)  ;;  %v2965_v6 = vld [vmem:[%s5642_s5 + $0x1e8] sm:$0xff] (%p41_p0) }
 0x1de   : > { %3874 = vmatpush1.bf16.msra.mxu0 %v3873_v11  ;;  %3906 = vmatpush1.bf16.msra.mxu1 %v3873_v11  ;;  %v2006_v11 = vld [vmem:[%s5642_s5 + $0x50] sm:$0xff] (%p41_p0) }
 0x1df   : > { %3876 = vmatprep.subr.bf16.mxu0 %v3875_v12  ;;  %3908 = vmatprep.subr.bf16.mxu1 %v3875_v12  ;;  %v2007_v12 = vld [vmem:[%s5642_s5 + $0x58] sm:$0xff] (%p41_p0) }
 0x1e0   :  { %v3951_v14 = vpack.c.bf16 (%p41_p0), %v2007_v12, %v2006_v11  ;;  %v2966_v11 = vld [vmem:[%s5642_s5 + $0x1f0] sm:$0xff] (%p41_p0)  ;;  %v2967_v12 = vld [vmem:[%s5642_s5 + $0x1f8] sm:$0xff] (%p41_p0) }
 0x1e2   : > { %3878 = vmatpush1.bf16.msra.mxu0 %v3877_v54  ;;  %3910 = vmatpush1.bf16.msra.mxu1 %v3877_v54  ;;  %v2932_v54 = vld [vmem:[%s5642_s5 + $0xe0] sm:$0xff] (%p41_p0) }
 0x1e3   :  { %3911 = vmatprep.subr.bf16.mxu0 (%p41_p0), %v4175_v44  ;;  %3935 = vmatprep.subr.bf16.mxu1 (%p41_p0), %v4175_v44 }
 0x1e5   : > { %1851 = vmatmul.mubr.f32.vlgmr.msra.gmra.mrb[4].mxu0 %v5124_v42  ;;  %1924 = vmatmul.mubr.f32.vlgmr.msra.gmra.mrb[4].mxu1 %v1752_v15  ;;  %v2921_v42 = vld [vmem:[%s5642_s5 + $0x88] sm:$0xff] (%p41_p0) }
 0x1e6   :  { %v3912_v45 = vpack.c.bf16 (%p41_p0), %v2921_v42, %v2920_v41  ;;  %3138 = vmatprep.mubr.msk.f32.mxu0 (%p41_p0), %vm4176_vm1, %v4177_v53  ;;  %3173 = vmatprep.mubr.msk.f32.mxu1 (%p41_p0), %vm4176_vm1, %v4177_v53  ;;  %v2933_v15 = vld [vmem:[%s5642_s5 + $0xe8] sm:$0xff] (%p41_p0)  ;;  %v2940_v41 = vld [vmem:[%s5642_s5 + $0x120] sm:$0xff] (%p41_p0) }
 0x1e7   :  { %3937 = vmatpush3.bf16.msra.mxu1 (%p41_p0), %v3936_v50  ;;  %v3930_v18 = vpack.c.bf16 (%p41_p0), %v2933_v15, %v2932_v54  ;;  %v2941_v42 = vld [vmem:[%s5642_s5 + $0x128] sm:$0xff] (%p41_p0)  ;;  %v2943_v50 = vld [vmem:[%s5642_s5 + $0x138] sm:$0xff] (%p41_p0)  ;;  %v2968_v54 = vld [vmem:[%s5642_s5 + $0x200] sm:$0xff] (%p41_p0) }
 0x1e8   :  { %3913 = vmatpush3.bf16.msra.mxu0 (%p41_p0), %v3912_v45  ;;  %3938 = vmatprep.subr.bf16.mxu1 (%p41_p0), %v4175_v44  ;;  %v2957_v45 = vld [vmem:[%s5642_s5 + $0x1a8] sm:$0xff] (%p41_p0)  ;;  %v3966_v47 = vpack.c.bf16 (%p41_p0), %v2941_v42, %v2940_v41  ;;  %v2450_v42 = vld [vmem:[%s5644_s7] sm:$0xff] (%p41_p0) }
 0x1e9   :  { %3914 = vmatprep.subr.bf16.mxu0 (%p41_p0), %v4175_v44  ;;  %v3990_v48 = vpack.c.bf16 (%p41_p0), %v2957_v45, %v2956_v43  ;;  %v2969_v15 = vld [vmem:[%s5642_s5 + $0x208] sm:$0xff] (%p41_p0)  ;;  %v2452_v45 = vld [vmem:[%s5644_s7 + $0x10] sm:$0xff] (%p41_p0) }
 0x1ea   :  { %v2451_v43 = vld [vmem:[%s5644_s7 + $0x8] sm:$0xff] (%p41_p0) }
 0x1eb   :  { %3940 = vmatpush3.bf16.msra.mxu1 (%p41_p0), %v3939_v56  ;;  %v3993_v56 = vpack.c.bf16 (%p41_p0), %v2959_v52, %v2958_v51  ;;  %v2456_v52 = vld [vmem:[%s5644_s7 + $0x30] sm:$0xff] (%p41_p0) }
 0x1ec   :  { %3916 = vmatpush3.bf16.msra.mxu0 (%p41_p0), %v3915_v55  ;;  %3941 = vmatprep.subr.bf16.mxu1 (%p41_p0), %v4175_v44  ;;  %v3969_v55 = vpack.c.bf16 (%p41_p0), %v2943_v50, %v2942_v49  ;;  %v2455_v50 = vld [vmem:[%s5644_s7 + $0x28] sm:$0xff] (%p41_p0) }
 0x1ed   :  { %3917 = vmatprep.subr.bf16.mxu0 (%p41_p0), %v4175_v44 }
 0x1ef   :  { %3943 = vmatpush3.bf16.msra.mxu1 (%p41_p0), %v3942_v61  ;;  %v3996_v61 = vpack.c.bf16 (%p41_p0), %v2961_v59, %v2960_v58  ;;  %v2460_v59 = vld [vmem:[%s5644_s7 + $0x50] sm:$0xff] (%p41_p0) }
 0x1f0   :  { %3919 = vmatpush3.bf16.msra.mxu0 (%p41_p0), %v3918_v60  ;;  %3944 = vmatprep.subr.bf16.mxu1 (%p41_p0), %v4175_v44  ;;  %v3972_v60 = vpack.c.bf16 (%p41_p0), %v2945_v7, %v2944_v57  ;;  %v2458_v57 = vld [vmem:[%s5644_s7 + $0x40] sm:$0xff] (%p41_p0)  ;;  %v2459_v7 = vld [vmem:[%s5644_s7 + $0x48] sm:$0xff] (%p41_p0) }
 0x1f1   :  { %3920 = vmatprep.subr.bf16.mxu0 (%p41_p0), %v4175_v44  ;;  %v4044_v58 = vpack.c.bf16 (%p41_p0), %v2459_v7, %v2458_v57 }
 0x1f3   :  { %3946 = vmatpush3.bf16.msra.mxu1 (%p41_p0), %v3945_v2  ;;  %v3999_v2 = vpack.c.bf16 (%p41_p0), %v2963_v22, %v2962_v0  ;;  %v2464_v22 = vld [vmem:[%s5644_s7 + $0x70] sm:$0xff] (%p41_p0) }
 0x1f4   :  { %3922 = vmatpush3.bf16.msra.mxu0 (%p41_p0), %v3921_v1  ;;  %3947 = vmatprep.subr.bf16.mxu1 (%p41_p0), %v4175_v44  ;;  %v3975_v1 = vpack.c.bf16 (%p41_p0), %v2947_v63, %v2946_v62  ;;  %v2462_v62 = vld [vmem:[%s5644_s7 + $0x60] sm:$0xff] (%p41_p0)  ;;  %v2463_v63 = vld [vmem:[%s5644_s7 + $0x68] sm:$0xff] (%p41_p0) }
 0x1f5   :  { %3923 = vmatprep.subr.bf16.mxu0 (%p41_p0), %v4175_v44  ;;  %v4050_v0 = vpack.c.bf16 (%p41_p0), %v2463_v63, %v2462_v62 }
 0x1f7   :  { %3949 = vmatpush3.bf16.msra.mxu1 (%p41_p0), %v3948_v9  ;;  %v4002_v9 = vpack.c.bf16 (%p41_p0), %v2965_v6, %v2964_v5  ;;  %v2546_v5 = vld [vmem:[%s5646_s9 + $0x10] sm:$0xff] (%p41_p0) }
 0x1f8   :  { %3925 = vmatpush3.bf16.msra.mxu0 (%p41_p0), %v3924_v8  ;;  %3950 = vmatprep.subr.bf16.mxu1 (%p41_p0), %v4175_v44  ;;  %v3978_v8 = vpack.c.bf16 (%p41_p0), %v2949_v4, %v2948_v3  ;;  %v2544_v3 = vld [vmem:[%s5646_s9] sm:$0xff] (%p41_p0)  ;;  %v2545_v4 = vld [vmem:[%s5646_s9 + $0x8] sm:$0xff] (%p41_p0) }
 0x1f9   :  { %3926 = vmatprep.subr.bf16.mxu0 (%p41_p0), %v4175_v44  ;;  %v4056_v6 = vpack.c.bf16 (%p41_p0), %v2545_v4, %v2544_v3 }
 0x1fb   :  { %3952 = vmatpush3.bf16.msra.mxu1 (%p41_p0), %v3951_v14  ;;  %v4005_v14 = vpack.c.bf16 (%p41_p0), %v2967_v12, %v2966_v11  ;;  %v2550_v12 = vld [vmem:[%s5646_s9 + $0x30] sm:$0xff] (%p41_p0) }
 0x1fc   :  { %3928 = vmatpush3.bf16.msra.mxu0 (%p41_p0), %v3927_v13  ;;  %3953 = vmatprep.subr.bf16.mxu1 (%p41_p0), %v4175_v44  ;;  %v3981_v13 = vpack.c.bf16 (%p41_p0), %v2951_v10, %v2950_v46  ;;  %v2548_v46 = vld [vmem:[%s5646_s9 + $0x20] sm:$0xff] (%p41_p0)  ;;  %v2549_v10 = vld [vmem:[%s5646_s9 + $0x28] sm:$0xff] (%p41_p0) }
 0x1fd   :  { %3929 = vmatprep.subr.bf16.mxu0 (%p41_p0), %v4175_v44  ;;  %v4062_v11 = vpack.c.bf16 (%p41_p0), %v2549_v10, %v2548_v46 }
 0x200   :  { %3931 = vmatpush3.bf16.msra.mxu0 (%p41_p0), %v3930_v18 }
 0x201   :  { %3932 = vmatprep.subr.bf16.mxu0 (%p41_p0), %v4175_v44 }
 0x2b8   : > { %v1852_v19 = vpop.f32.mrb[4].mxu0  ;;  %v1925_v20 = vpop.f32.mrb[4].mxu1 }
 0x2b9   : > { %v1854_v21 = vpop.f32.mrb[5].mxu0  ;;  %v1927_v23 = vpop.f32.mrb[5].mxu1 }
 0x2ba   : > { %v1932_v24 = vmax.f32 %v1852_v19, %v1854_v21  ;;  %v1933_v25 = vmax.f32 %v1925_v20, %v1927_v23  ;;  %v3954_v19 = vpack.c.bf16 (%p41_p0), %v2009_v17, %v2008_v16  ;;  %v2934_v20 = vld [vmem:[%s5642_s5 + $0xf0] sm:$0xff] (%p41_p0)  ;;  %v2935_v21 = vld [vmem:[%s5642_s5 + $0xf8] sm:$0xff] (%p41_p0)  ;;  %v4008_v17 = vpack.c.bf16 (%p41_p0), %v2969_v15, %v2968_v54  ;;  %v2552_v54 = vld [vmem:[%s5646_s9 + $0x40] sm:$0xff] (%p41_p0) }
 0x2bb   :  { %v2010_v23 = vld [vmem:[%s5642_s5 + $0x70] sm:$0xff] (%p41_p0)  ;;  %v2553_v15 = vld [vmem:[%s5646_s9 + $0x48] sm:$0xff] (%p41_p0) }
 0x2bc   : > { %v1934_v29 = vmax.f32 %v1932_v24, %v1933_v25  ;;  %v2011_v24 = vld [vmem:[%s5642_s5 + $0x78] sm:$0xff] (%p41_p0)  ;;  %v3933_v25 = vpack.c.bf16 (%p41_p0), %v2935_v21, %v2934_v20  ;;  %3955 = vmatpush3.bf16.msra.mxu1 (%p41_p0), %v3954_v19  ;;  %v2970_v19 = vld [vmem:[%s5642_s5 + $0x210] sm:$0xff] (%p41_p0) }
 0x2bd   :  { %v3957_v26 = vpack.c.bf16 (%p41_p0), %v2011_v24, %v2010_v23  ;;  %3956 = vmatprep.subr.bf16.mxu1 (%p41_p0), %v4175_v44  ;;  %v2971_v20 = vld [vmem:[%s5642_s5 + $0x218] sm:$0xff] (%p41_p0)  ;;  %v2972_v23 = vld [vmem:[%s5642_s5 + $0x220] sm:$0xff] (%p41_p0)  ;;  %v2973_v24 = vld [vmem:[%s5642_s5 + $0x228] sm:$0xff] (%p41_p0) }
 0x2be   : > { %v1942_v30 = vadd.f32 %v2916_v28, %v1934_v29  ;;  %v2937_v28 = vld [vmem:[%s5642_s5 + $0x108] sm:$0xff] (%p41_p0)  ;;  %v2952_v29 = vld [vmem:[%s5642_s5 + $0x180] sm:$0xff] (%p41_p0)  ;;  %3934 = vmatpush3.bf16.msra.mxu0 (%p41_p0), %v3933_v25  ;;  %v4011_v21 = vpack.c.bf16 (%p41_p0), %v2971_v20, %v2970_v19  ;;  %v4014_v25 = vpack.c.bf16 (%p41_p0), %v2973_v24, %v2972_v23 }
 0x2bf   :  { %3959 = vmatprep.subr.bf16.mxu0 (%p41_p0), %v4175_v44  ;;  %v2556_v20 = vld [vmem:[%s5646_s9 + $0x60] sm:$0xff] (%p41_p0) }
 0x2c0   : > { %v1943_v32 = vmax.f32 %v1942_v30, 0.0  ;;  %v2953_v30 = vld [vmem:[%s5642_s5 + $0x188] sm:$0xff] (%p41_p0)  ;;  %3958 = vmatpush3.bf16.msra.mxu1 (%p41_p0), %v3957_v26  ;;  %v2974_v26 = vld [vmem:[%s5642_s5 + $0x230] sm:$0xff] (%p41_p0) }
 0x2c1   :  { %3983 = vmatprep.subr.bf16.mxu1 (%p41_p0), %v4175_v44 }
 0x2c2   : > { %v1945_v33 = vcombine.high %v1943_v32, %v1943_v32  ;;  %v1952_v34 = vrot.slane %v1943_v32, %v1951_v31  ;;  %v3960_v32 = vpack.c.bf16 (%p41_p0), %v2937_v28, %v2936_v27  ;;  %v2975_v27 = vld [vmem:[%s5642_s5 + $0x238] sm:$0xff] (%p41_p0) }
 0x2c3   :  { %v4017_v28 = vpack.c.bf16 (%p41_p0), %v2975_v27, %v2974_v26 }
 0x2c4   : > { %v1959_v35 = vrot.slane %v1945_v33, %v1951_v31  ;;  %v1960_v36 = vcombine.high %v1952_v34, %v1952_v34  ;;  %v1967_v37 = vrot.slane %v1952_v34, %v1951_v31  ;;  %2917 = vst.sshfl [vmem:[%s1989_s22] sm:$0x1 pattern:$0x73625140] %v1952_v34  ;;  %43 = sbr.rel (!%p41_p0) target bundleno = 1 (0x1), region = 95  ;;  %v3984_v34 = vpack.c.bf16 (%p41_p0), %v2953_v30, %v2952_v29  ;;  %v2976_v29 = vld [vmem:[%s5642_s5 + $0x240] sm:$0xff] (%p41_p0)  ;;  %v2977_v30 = vld [vmem:[%s5642_s5 + $0x248] sm:$0xff] (%p41_p0) }
 0x2c6   : > { %v1981_v38 = vrot.slane %v1960_v36, %v1951_v31  ;;  %v1982_v39 = vcombine.high %v1967_v37, %v1967_v37  ;;  %2918 = vst.sshfl [vmem:[%s1989_s22 + $0x8] sm:$0x1 pattern:$0x73625140] %v1960_v36  ;;  %v2939_v36 = vld [vmem:[%s5642_s5 + $0x118] sm:$0xff] (%p41_p0)  ;;  %v2954_v37 = vld [vmem:[%s5642_s5 + $0x190] sm:$0xff] (%p41_p0) }
 0x2c7   : > { %2919 = vst.sshfl [vmem:[%s1989_s22 + $0x20] sm:$0x1 pattern:$0x73625140] %v1959_v35  ;;  %v2938_v35 = vld [vmem:[%s5642_s5 + $0x110] sm:$0xff] (%p41_p0) }
 0x2c8   : > { %v1983_v40 = vcombine.high %v1981_v38, %v1981_v38  ;;  %1992 = vst [vmem:[%s1989_s22 + $0x10] sm:$0x1] %v1982_v39  ;;  %v2955_v38 = vld [vmem:[%s5642_s5 + $0x198] sm:$0xff] (%p41_p0)  ;;  %v3963_v39 = vpack.c.bf16 (%p41_p0), %v2939_v36, %v2938_v35  ;;  %v2980_v35 = vld [vmem:[%s5642_s5 + $0x260] sm:$0xff] (%p41_p0)  ;;  %v2981_v36 = vld [vmem:[%s5642_s5 + $0x268] sm:$0xff] (%p41_p0) }
 0x2ca   : > { %1993 = vst [vmem:[%s1989_s22 + $0x18] sm:$0x1] %v1983_v40  ;;  %v3987_v40 = vpack.c.bf16 (%p41_p0), %v2955_v38, %v2954_v37  ;;  %v4026_v37 = vpack.c.bf16 (%p41_p0), %v2981_v36, %v2980_v35  ;;  %v2982_v38 = vld [vmem:[%s5642_s5 + $0x270] sm:$0xff] (%p41_p0)  ;;  %v2984_v36 = vld [vmem:[%s5643_s6] ss:$0 sm:$0xff] (%p41_p0) }
 0x2d1   :  { %v2013_v31 = vld [vmem:[#allocation3 + $0x8] sm:$0xff]  ;;  %v1995_v33 = vld [vmem:[#allocation3] sm:$0xff]  ;;  %v2172_v16 = vld [vmem:[#allocation3 + $0x10] sm:$0xff] }
 0x2d2   :  { %3139 = vmatmul.mubr.f32.vlgmr.msra.gmra.mrb[0].mxu0 %v2013_v31  ;;  %3174 = vmatmul.mubr.f32.vlgmr.msra.gmra.mrb[0].mxu1 %v1995_v33  ;;  %v2262_v18 = vld [vmem:[#allocation3 + $0x18] sm:$0xff]  ;;  %v4020_v31 = vpack.c.bf16 %v2977_v30, %v2976_v29  ;;  %v2979_v33 = vld [vmem:[%s5642_s5 + $0x258] sm:$0xff]  ;;  %v2352_v41 = vld [vmem:[#allocation3 + $0x20] sm:$0xff] }
 0x2d3   :  { %3961 = vmatpush3.bf16.msra.mxu0 %v3960_v32  ;;  %3985 = vmatpush3.bf16.msra.mxu1 %v3984_v34  ;;  %v2978_v32 = vld [vmem:[%s5642_s5 + $0x250] sm:$0xff] }
 0x2d4   :  { %3962 = vmatprep.subr.bf16.mxu0 %v4175_v44  ;;  %3986 = vmatprep.subr.bf16.mxu1 %v4175_v44  ;;  %v4023_v34 = vpack.c.bf16 %v2979_v33, %v2978_v32 }
 0x2d5   :  { %3208 = vmatprep.mubr.msk.f32.mxu0 %vm4176_vm1, %v4177_v53  ;;  %3243 = vmatprep.mubr.msk.f32.mxu1 %vm4176_vm1, %v4177_v53 }
 0x2d7   :  { %3964 = vmatpush3.bf16.msra.mxu0 %v3963_v39  ;;  %3988 = vmatpush3.bf16.msra.mxu1 %v3987_v40  ;;  %v2983_v39 = vld [vmem:[%s5642_s5 + $0x278] sm:$0xff] }
 0x2d8   :  { %3965 = vmatprep.subr.bf16.mxu0 %v4175_v44  ;;  %3989 = vmatprep.subr.bf16.mxu1 %v4175_v44  ;;  %v4029_v40 = vpack.c.bf16 %v2983_v39, %v2982_v38 }
 0x2db   :  { %3967 = vmatpush3.bf16.msra.mxu0 %v3966_v47  ;;  %3991 = vmatpush3.bf16.msra.mxu1 %v3990_v48  ;;  %v4032_v47 = vpack.c.bf16 %v2451_v43, %v2450_v42  ;;  %v2453_v48 = vld [vmem:[%s5644_s7 + $0x18] sm:$0xff]  ;;  %v2985_v43 = vld [vmem:[%s5645_s8] ss:$0 sm:$0xff] }
 0x2dc   :  { %3968 = vmatprep.subr.bf16.mxu0 %v4175_v44  ;;  %3992 = vmatprep.subr.bf16.mxu1 %v4175_v44  ;;  %v4035_v49 = vpack.c.bf16 %v2453_v48, %v2452_v45 }
 0x2df   :  { %3970 = vmatpush3.bf16.msra.mxu0 %v3969_v55  ;;  %3994 = vmatpush3.bf16.msra.mxu1 %v3993_v56  ;;  %v2457_v55 = vld [vmem:[%s5644_s7 + $0x38] sm:$0xff] }
 0x2e0   :  { %3971 = vmatprep.subr.bf16.mxu0 %v4175_v44  ;;  %3995 = vmatprep.subr.bf16.mxu1 %v4175_v44  ;;  %v4041_v56 = vpack.c.bf16 %v2457_v55, %v2456_v52 }
 0x2e3   :  { %3973 = vmatpush3.bf16.msra.mxu0 %v3972_v60  ;;  %3997 = vmatpush3.bf16.msra.mxu1 %v3996_v61  ;;  %v2461_v60 = vld [vmem:[%s5644_s7 + $0x58] sm:$0xff] }
 0x2e4   :  { %3974 = vmatprep.subr.bf16.mxu0 %v4175_v44  ;;  %3998 = vmatprep.subr.bf16.mxu1 %v4175_v44  ;;  %v4047_v61 = vpack.c.bf16 %v2461_v60, %v2460_v59 }
 0x2e7   :  { %3976 = vmatpush3.bf16.msra.mxu0 %v3975_v1  ;;  %4000 = vmatpush3.bf16.msra.mxu1 %v3999_v2  ;;  %v2465_v1 = vld [vmem:[%s5644_s7 + $0x78] sm:$0xff] }
 0x2e8   :  { %3977 = vmatprep.subr.bf16.mxu0 %v4175_v44  ;;  %4001 = vmatprep.subr.bf16.mxu1 %v4175_v44  ;;  %v4053_v2 = vpack.c.bf16 %v2465_v1, %v2464_v22 }
 0x2eb   :  { %3979 = vmatpush3.bf16.msra.mxu0 %v3978_v8  ;;  %4003 = vmatpush3.bf16.msra.mxu1 %v4002_v9  ;;  %v2547_v8 = vld [vmem:[%s5646_s9 + $0x18] sm:$0xff] }
 0x2ec   :  { %3980 = vmatprep.subr.bf16.mxu0 %v4175_v44  ;;  %4004 = vmatprep.subr.bf16.mxu1 %v4175_v44  ;;  %v4059_v9 = vpack.c.bf16 %v2547_v8, %v2546_v5 }
 0x2ef   :  { %3982 = vmatpush3.bf16.msra.mxu0 %v3981_v13  ;;  %4006 = vmatpush3.bf16.msra.mxu1 %v4005_v14  ;;  %v2551_v13 = vld [vmem:[%s5646_s9 + $0x38] sm:$0xff] }
 0x2f0   :  { %4007 = vmatprep.subr.bf16.mxu0 %v4175_v44  ;;  %4031 = vmatprep.subr.bf16.mxu1 %v4175_v44  ;;  %v4065_v14 = vpack.c.bf16 %v2551_v13, %v2550_v12 }
 0x2f2   :  { %3209 = vmatmul.mubr.f32.vlgmr.msra.gmra.mrb[2].mxu0 %v2172_v16  ;;  %3244 = vmatmul.mubr.f32.vlgmr.msra.gmra.mrb[2].mxu1 %v2262_v18  ;;  %v4068_v16 = vpack.c.bf16 %v2553_v15, %v2552_v54  ;;  %v2555_v18 = vld [vmem:[%s5646_s9 + $0x58] sm:$0xff] }
 0x2f3   :  { %4009 = vmatpush3.bf16.msra.mxu0 %v4008_v17  ;;  %3278 = vmatprep.mubr.msk.f32.mxu0 %vm4176_vm1, %v4177_v53  ;;  %v2554_v17 = vld [vmem:[%s5646_s9 + $0x50] sm:$0xff] }
 0x2f4   :  { %4010 = vmatprep.subr.bf16.mxu0 %v4175_v44  ;;  %3313 = vmatprep.mubr.msk.f32.mxu1 %vm4176_vm1, %v4177_v53  ;;  %v4071_v19 = vpack.c.bf16 %v2555_v18, %v2554_v17 }
 0x2f5   :  { %4033 = vmatpush3.bf16.msra.mxu1 %v4032_v47 }
 0x2f6   :  { %4034 = vmatprep.subr.bf16.mxu1 %v4175_v44 }
 0x2f7   :  { %4012 = vmatpush3.bf16.msra.mxu0 %v4011_v21  ;;  %v2557_v21 = vld [vmem:[%s5646_s9 + $0x68] sm:$0xff] }
 0x2f8   :  { %4013 = vmatprep.subr.bf16.mxu0 %v4175_v44  ;;  %v4074_v23 = vpack.c.bf16 %v2557_v21, %v2556_v20 }
 0x2f9   :  { %4036 = vmatpush3.bf16.msra.mxu1 %v4035_v49 }
 0x2fa   :  { %4037 = vmatprep.subr.bf16.mxu1 %v4175_v44 }
 0x2fb   :  { %4015 = vmatpush3.bf16.msra.mxu0 %v4014_v25 }
 0x2fc   :  { %4016 = vmatprep.subr.bf16.mxu0 %v4175_v44 }
 0x2ff   :  { %4018 = vmatpush3.bf16.msra.mxu0 %v4017_v28 }
 0x300   :  { %4019 = vmatprep.subr.bf16.mxu0 %v4175_v44 }
 0x303   :  { %4021 = vmatpush3.bf16.msra.mxu0 %v4020_v31 }
 0x304   :  { %4022 = vmatprep.subr.bf16.mxu0 %v4175_v44 }
 0x307   :  { %4024 = vmatpush3.bf16.msra.mxu0 %v4023_v34 }
 0x308   :  { %4025 = vmatprep.subr.bf16.mxu0 %v4175_v44 }
 0x30b   :  { %4027 = vmatpush3.bf16.msra.mxu0 %v4026_v37 }
 0x30c   :  { %4028 = vmatprep.subr.bf16.mxu0 %v4175_v44 }
 0x30f   :  { %4030 = vmatpush3.bf16.msra.mxu0 %v4029_v40  ;;  %v2558_v40 = vld [vmem:[%s5646_s9 + $0x70] sm:$0xff] }
 0x310   :  { %4055 = vmatprep.subr.bf16.mxu0 %v4175_v44 }
 0x312   :  { %3279 = vmatmul.mubr.f32.vlgmr.msra.gmra.mrb[4].mxu0 %v2352_v41  ;;  %v2559_v41 = vld [vmem:[%s5646_s9 + $0x78] sm:$0xff]  ;;  %s4141_s9 = scalar_lea.vmem %s2645_s1, 128 }
 0x313   :  { %3348 = vmatprep.mubr.msk.f32.mxu0 %vm4176_vm1, %v4177_v53  ;;  %v2454_v53 = vld [vmem:[%s5644_s7 + $0x20] sm:$0xff]  ;;  %4057 = vmatpush3.bf16.msra.mxu0 %v4056_v6  ;;  %v4077_v42 = vpack.c.bf16 %v2559_v41, %v2558_v40  ;;  %p4142_p1 = scmp.ne.s32.totalorder %s2645_s1, %s4141_s9  ;;  %p4147_p3 = scmp.lt.s32.totalorder %s4141_s9, %s4141_s9 }
 0x314   :  { %v4038_v51 = vpack.c.bf16 %v2455_v50, %v2454_v53  ;;  %4058 = vmatprep.subr.bf16.mxu0 %v4175_v44  ;;  %v2986_v53 = vld [vmem:[%s5647_s10] ss:$0 sm:$0xff] }
 0x315   :  { %p4148_p4 = por %p4147_p3, %p4146_p2 }
 0x316   :  { %4039 = vmatpush3.bf16.msra.mxu1 %v4038_v51 }
 0x317   :  { %4040 = vmatprep.subr.bf16.mxu1 %v4175_v44  ;;  %4060 = vmatpush3.bf16.msra.mxu0 %v4059_v9  ;;  %p4149_p5 = pnand %p4148_p4, %p4142_p1 }
 0x318   :  { %4061 = vmatprep.subr.bf16.mxu0 %v4175_v44 }
 0x31a   :  { %4042 = vmatpush3.bf16.msra.mxu1 %v4041_v56 }
 0x31b   :  { %4043 = vmatprep.subr.bf16.mxu1 %v4175_v44  ;;  %4063 = vmatpush3.bf16.msra.mxu0 %v4062_v11 }
 0x31c   :  { %4064 = vmatprep.subr.bf16.mxu0 %v4175_v44 }
 0x31e   :  { %4045 = vmatpush3.bf16.msra.mxu1 %v4044_v58 }
 0x31f   :  { %4046 = vmatprep.subr.bf16.mxu1 %v4175_v44  ;;  %4066 = vmatpush3.bf16.msra.mxu0 %v4065_v14 }
 0x320   :  { %4067 = vmatprep.subr.bf16.mxu0 %v4175_v44 }
 0x322   :  { %4048 = vmatpush3.bf16.msra.mxu1 %v4047_v61 }
 0x323   :  { %4049 = vmatprep.subr.bf16.mxu1 %v4175_v44  ;;  %4069 = vmatpush3.bf16.msra.mxu0 %v4068_v16 }
 0x324   :  { %4070 = vmatprep.subr.bf16.mxu0 %v4175_v44 }
 0x326   :  { %4051 = vmatpush3.bf16.msra.mxu1 %v4050_v0 }
 0x327   :  { %4052 = vmatprep.subr.bf16.mxu1 %v4175_v44  ;;  %4072 = vmatpush3.bf16.msra.mxu0 %v4071_v19 }
 0x328   :  { %4073 = vmatprep.subr.bf16.mxu0 %v4175_v44 }
 0x32a   :  { %4054 = vmatpush3.bf16.msra.mxu1 %v4053_v2 }
 0x32b   :  { %4075 = vmatpush3.bf16.msra.mxu0 %v4074_v23 }
 0x32c   :  { %4076 = vmatprep.subr.bf16.mxu0 %v4175_v44 }
 0x32f   :  { %4078 = vmatpush3.bf16.msra.mxu0 %v4077_v42 }
 0x3a5   :  { %v2097_v24 = vpop.f32.mrb[0].mxu0  ;;  %v2167_v26 = vpop.f32.mrb[0].mxu1 }
 0x3a6   :  { %v3140_v25 = vpop.f32.mrb[1].mxu0  ;;  %v2168_v27 = vadd.f32 %v2167_v26, %v2097_v24  ;;  %v3175_v28 = vpop.f32.mrb[1].mxu1 }
 0x3c5   :  { %v2256_v29 = vpop.f32.mrb[2].mxu0  ;;  %v2346_v32 = vpop.f32.mrb[2].mxu1 }
 0x3c6   :  { %v2260_v30 = vadd.f32 %v2256_v29, %v2168_v27  ;;  %v3210_v31 = vpop.f32.mrb[3].mxu0  ;;  %v3245_v33 = vpop.f32.mrb[3].mxu1 }
 0x3c8   :  { %v2350_v34 = vadd.f32 %v2346_v32, %v2260_v30 }
 0x3e5   :  { %v2436_v35 = vpop.f32.mrb[4].mxu0 }
 0x3e6   :  { %v2440_v37 = vadd.f32 %v2436_v35, %v2350_v34  ;;  %v3280_v38 = vpop.f32.mrb[5].mxu0 }
 0x3e8   :  { %v2448_v39 = vadd.f32 %v2984_v36, %v2440_v37 }
 0x3ea   :  { %v2449_v44 = vmax.f32 %v2448_v39, 0.0 }
 0x3ec   :  { %3314 = vmatmul.mubr.f32.vlgmr.msra.gmra.mrb[4].mxu1 %v2449_v44 }
 0x4bf   :  { %v2539_v45 = vpop.f32.mrb[4].mxu1 }
 0x4c0   :  { %v2540_v47 = vadd.f32 %v2985_v43, %v2539_v45  ;;  %v3315_v48 = vpop.f32.mrb[5].mxu1 }
 0x4c2   :  { %v2543_v49 = vmax.f32 %v2540_v47, 0.0 }
 0x4c4   :  { %3349 = vmatmul.mubr.f32.vlgmr.msra.gmra.mrb[6].mxu0 %v2543_v49 }
 0x597   :  { %v2633_v50 = vpop.f32.mrb[6].mxu0 }
 0x598   :  { %v2634_v51 = vadd.f32 %v2986_v53, %v2633_v50  ;;  %v3350_v52 = vpop.f32.mrb[7].mxu0 }
 0x59a   :  { %2637 = vst [vmem:[#allocation4] sm:$0xff] %v2634_v51 }
 0x59b   :  { %4152 = shalt.err (!%p4149_p5)
}
 0x59c   :  { %s4153_s3 = scalar_lea.hbm %s5648_s11, 128 }
 0x59d   :  { %p4154_p6 = scmp.ne.s32.totalorder %s5648_s11, %s4153_s3  ;;  %p4157_p7 = scmp.lt.u32.totalorder %s4153_s3, %s5648_s11 }
 0x59f   :  { %p4159_p8 = pnand %p4157_p7, %p4154_p6 }
 0x5a1   :  { %4162 = shalt.err (!%p4159_p8)
}
 0x5a2   :  { %2647 = dma.vmem_to_hbm [thread:$0]  %s2645_s1, 128, %s5648_s11, [#allocation5]  }
 0x5a3   :  { %4167 = dma.done.wait [#allocation5], 128  }
 0x5a4   :  { %4168 = vsyncadd [#allocation5], 4294967168 }
 0x5a5   :  { %2651 = vsyncpa [#allocation5], 1 }

</bundles_post_ra>
